<compile_context>
chip_gen: v6e
topology: v6e:2x2x1
jax: 0.10.0
libtpu: 0.0.40
codegen_flags: <defaults>
</compile_context>

<pallas_src>
import jax
import jax.numpy as jnp
from jax import lax
from jax.experimental import pallas as pl
from jax.experimental.pallas import tpu as pltpu

_EPS = 1e-5
_LANE = 128


def _round_up(x, m):
    return (x + m - 1) // m * m


def _elu(v):
    # ELU(alpha=1): x if x > 0 else exp(x) - 1   (ELU(0) == 0 -> zero padding commutes)
    return jnp.where(v > 0, v, jnp.exp(jnp.minimum(v, 0.0)) - 1.0)


def _compiler_params(semantics, live_block_bytes):
    # Scoped-VMEM limit sized from the (single-buffer) block footprint, doubled for
    # double-buffering plus margin, clamped to [32 MiB, 64 MiB] (valid on v5e/v6e/v7x).
    limit = int(max(32 << 20, min(64 << 20, 2 * live_block_bytes + (4 << 20))))
    return pltpu.CompilerParams(dimension_semantics=semantics, vmem_limit_bytes=limit)


# ---------------- Pallas kernels ----------------

def _make_down_kernel(hi, wi, kin):
    """ELU -> Conv2d(4, s2, p1, bias=False) -> ELU for one batch element.

    The stride-2 4x4 conv is a 2x2/stride-1 conv over the space-to-depth transform of
    the already-ELU'd, zero-padded input; the 4 shifted windows are sliced from the
    VMEM block and accumulated as bf16 MXU matmuls (in-kernel im2col)."""

    def kernel(xs_ref, w_ref, o_ref):
        inner_p = o_ref.shape[-1]
        acc = jnp.zeros((hi * wi, inner_p), jnp.float32)
        for dh in range(2):
            # Leading-dim slice (free); f32 so the (hi, wi, kin)->(hi*wi, kin) collapse
            # below is layout-preserving (wi is a multiple of the 8-sublane tile).
            slab = xs_ref[0, dh:dh + hi, :, :].astype(jnp.float32)    # (hi, wi+1, kin)
            for dw in range(2):
                win = slab[:, dw:dw + wi, :].reshape(hi * wi, kin)
                acc = acc + jnp.dot(win.astype(jnp.bfloat16), w_ref[2 * dh + dw],
                                    preferred_element_type=jnp.float32)
        o_ref[0] = _elu(acc).astype(o_ref.dtype)

    return kernel


def _make_up_kernel(hi, wi, inner_p):
    """ConvTranspose2d(4, s2, p1, bias=False) via 4 sub-pixel phases (single GEMM over
    a 3x3 window of the zero-padded hidden activation), fused with BatchNorm pass 1:
    writes the unnormalised y (bf16) and accumulates per-column sum / sum-of-squares
    so the GEMM never has to be recomputed for the normalise pass."""

    def kernel(hp_ref, w_ref, y_ref, sum_ref, ssq_ref):
        @pl.when(pl.program_id(1) == 0)
        def _():
            sum_ref[...] = jnp.zeros_like(sum_ref)
            ssq_ref[...] = jnp.zeros_like(ssq_ref)

        c2p = y_ref.shape[-1]
        acc = jnp.zeros((hi * wi, c2p), jnp.float32)
        for dh in range(3):
            slab = hp_ref[0, dh:dh + hi, :, :].astype(jnp.float32)  # (hi, wi+2, inner_p)
            for dw in range(3):
                win = slab[:, dw:dw + wi, :].reshape(hi * wi, inner_p)
                acc = acc + jnp.dot(win.astype(jnp.bfloat16), w_ref[3 * dh + dw],
                                    preferred_element_type=jnp.float32)

        yb = acc.astype(jnp.bfloat16)
        y_ref[0] = yb
        yf = yb.astype(jnp.float32)        # stats of exactly what gets normalised
        sum_ref[0] = sum_ref[0] + jnp.sum(yf, axis=0, keepdims=True)
        ssq_ref[0] = ssq_ref[0] + jnp.sum(yf * yf, axis=0, keepdims=True)

    return kernel


def _norm_kernel(y_ref, sc_ref, sh_ref, o_ref):
    # BatchNorm pass 2: pure VPU y*scale + shift, in place (input_output_aliases).
    y = y_ref[0].astype(jnp.float32)
    o_ref[0] = (y * sc_ref[...] + sh_ref[...]).astype(o_ref.dtype)


# ---------------- pallas_call wrappers ----------------

def _down_call(xs, w1, hi, wi):
    n, _, _, kin = xs.shape
    inner_p = w1.shape[-1]
    blocks = ((hi + 1) * (wi + 1) * kin * 2 + 4 * kin * inner_p * 2
              + hi * wi * inner_p * 2)
    return pl.pallas_call(
        _make_down_kernel(hi, wi, kin),
        out_shape=jax.ShapeDtypeStruct((n, hi * wi, inner_p), jnp.bfloat16),
        grid=(n,),
        in_specs=[pl.BlockSpec((1, hi + 1, wi + 1, kin), lambda b: (b, 0, 0, 0)),
                  # NOTE: constant-index resident weight; at production channel counts
                  # add pipeline_mode=pl.Buffered(1) here to drop its double buffer.
                  pl.BlockSpec((4, kin, inner_p), lambda b: (0, 0, 0))],
        out_specs=pl.BlockSpec((1, hi * wi, inner_p), lambda b: (b, 0, 0)),
        compiler_params=_compiler_params(("parallel",), blocks),
        cost_estimate=pl.CostEstimate(
            flops=2 * n * hi * wi * 4 * kin * inner_p,
            transcendentals=n * hi * wi * inner_p,
            bytes_accessed=xs.size * 2 + w1.size * 2 + n * hi * wi * inner_p * 2),
    )(xs, w1)


def _up_call(hp, w2, n_split):
    n, hpp, wpp, inner_p = hp.shape
    hi, wi = hpp - 2, wpp - 2
    c2p = w2.shape[-1]
    nin = n // n_split
    m_blk = hi * wi
    blocks = (hpp * wpp * inner_p * 2 + 9 * inner_p * c2p * 2
              + m_blk * c2p * 2 + 2 * c2p * 4)
    return pl.pallas_call(
        _make_up_kernel(hi, wi, inner_p),
        out_shape=(jax.ShapeDtypeStruct((n, m_blk, c2p), jnp.bfloat16),
                   jax.ShapeDtypeStruct((n_split, 1, c2p), jnp.float32),
                   jax.ShapeDtypeStruct((n_split, 1, c2p), jnp.float32)),
        grid=(n_split, nin),
        in_specs=[pl.BlockSpec((1, hpp, wpp, inner_p),
                               lambda s, j: (s * nin + j, 0, 0, 0)),
                  pl.BlockSpec((9, inner_p, c2p), lambda s, j: (0, 0, 0))],
        out_specs=(pl.BlockSpec((1, m_blk, c2p), lambda s, j: (s * nin + j, 0, 0)),
                   pl.BlockSpec((1, 1, c2p), lambda s, j: (s, 0, 0)),
                   pl.BlockSpec((1, 1, c2p), lambda s, j: (s, 0, 0))),
        compiler_params=_compiler_params(("parallel", "arbitrary"), blocks),
        cost_estimate=pl.CostEstimate(
            flops=2 * n * m_blk * 9 * inner_p * c2p,
            transcendentals=0,
            bytes_accessed=hp.size * 2 + w2.size * 2 + n * m_blk * c2p * 2),
    )(hp, w2)


def _norm_call(y, scale_col, shift_col):
    n, m_blk, c2p = y.shape
    blocks = 2 * m_blk * c2p * 2 + 2 * c2p * 4
    return pl.pallas_call(
        _norm_kernel,
        out_shape=jax.ShapeDtypeStruct((n, m_blk, c2p), jnp.bfloat16),
        grid=(n,),
        in_specs=[pl.BlockSpec((1, m_blk, c2p), lambda b: (b, 0, 0)),
                  pl.BlockSpec((1, c2p), lambda b: (0, 0)),
                  pl.BlockSpec((1, c2p), lambda b: (0, 0))],
        out_specs=pl.BlockSpec((1, m_blk, c2p), lambda b: (b, 0, 0)),
        input_output_aliases={0: 0},          # normalise y in place (bf16)
        compiler_params=_compiler_params(("parallel",), blocks),
    )(y, scale_col, shift_col)


# ---------------- weight re-layouts (XLA, tiny) ----------------

def _build_down_weight(w_down, cin, inner, inner_p):
    # Conv2d(k=4, s=2, p=1) == 2x2/stride-1 conv over space-to-depth(padded input):
    # tap t = 2*dh + dw, row (p*2 + q)*cin + c, col = output channel (lane-padded).
    w = jnp.transpose(w_down, (2, 3, 1, 0))                   # (kh, kw, cin, inner)
    w = w.reshape(2, 2, 2, 2, cin, inner)                     # (dh, p, dw, q, c, o)
    w = jnp.transpose(w, (0, 2, 1, 3, 4, 5)).reshape(4, 4 * cin, inner)
    w = jnp.pad(w, ((0, 0), (0, 0), (0, inner_p - inner)))
    return w.astype(jnp.bfloat16)


def _build_up_weight(w_up, inner, outer, inner_p, c2p):
    # ConvTranspose2d(k=4, s=2, p=1) sub-pixel decomposition: output pixel
    # (2i+ph, 2j+pw) is a dot over a 3x3 window of the zero-padded hidden activation.
    # taps[ph] lists the (dh, kh) pairs contributing for row phase ph (same for width);
    # unused taps stay zero.  Column = (ph*2+pw)*outer + co, lane-padded to c2p.
    taps = (((0, 3), (1, 1)), ((1, 2), (2, 0)))
    w = jnp.zeros((9, inner_p, c2p), jnp.float32)
    for ph in range(2):
        for pw in range(2):
            col = (ph * 2 + pw) * outer
            for dh, kh in taps[ph]:
                for dw, kw in taps[pw]:
                    w = w.at[3 * dh + dw, :inner, col:col + outer].set(w_up[:, :, kh, kw])
    return w.astype(jnp.bfloat16)


# ---------------- forward ----------------

def unet_innermost_forward(x, w_down, w_up, gamma, beta):
    """x: (N, input_nc, H, W) NCHW f32.  Returns cat([x, block(x)], axis=1), f32."""
    n, cin, h, w = x.shape
    inner = w_down.shape[0]
    outer = w_up.shape[1]
    assert h % 2 == 0 and w % 2 == 0, "H and W must be even"
    hi, wi = h // 2, w // 2
    assert wi % 8 == 0, "W/2 must be a multiple of 8 (sublane tile) for in-kernel im2col"

    kin = 4 * cin
    inner_p = _round_up(inner, _LANE)
    c2 = 4 * outer
    c2p = _round_up(c2, _LANE)
    n_split = 2 if (n % 2 == 0 and n >= 2) else 1

    # ---- down path prep: ELU once, NHWC, pad 1, space-to-depth (no patch matrix) ----
    a = jnp.transpose(_elu(x), (0, 2, 3, 1))                          # NHWC f32
    ap = jnp.pad(a, ((0, 0), (1, 1), (1, 1), (0, 0)))
    xs = ap.reshape(n, hi + 1, 2, wi + 1, 2, cin)
    xs = xs.transpose(0, 1, 3, 2, 4, 5).reshape(n, hi + 1, wi + 1, kin)
    xs = xs.astype(jnp.bfloat16)
    w1 = _build_down_weight(w_down, cin, inner, inner_p)
    hm = _down_call(xs, w1, hi, wi)             # (n, hi*wi, inner_p) bf16 = ELU(conv)

    # ---- up path: ConvT via sub-pixel phases, single GEMM fused with BN stats ----
    hp = jnp.pad(hm.reshape(n, hi, wi, inner_p), ((0, 0), (1, 1), (1, 1), (0, 0)))
    w2 = _build_up_weight(w_up, inner, outer, inner_p, c2p)
    y, col_sum, col_ssq = _up_call(hp, w2, n_split)

    count = jnp.float32(n * h * w)              # true element count per output channel
    tot_sum = col_sum.sum(axis=(0, 1))[:c2].reshape(4, outer).sum(axis=0)
    tot_ssq = col_ssq.sum(axis=(0, 1))[:c2].reshape(4, outer).sum(axis=0)
    mean = tot_sum / count
    var = jnp.maximum(tot_ssq / count - mean * mean, 0.0)     # clamp E[x^2]-E[x]^2 >= 0
    scale = gamma * lax.rsqrt(var + _EPS)
    shift = beta - mean * scale
    scale_col = jnp.pad(jnp.tile(scale, 4), (0, c2p - c2)).reshape(1, c2p)
    shift_col = jnp.pad(jnp.tile(shift, 4), (0, c2p - c2)).reshape(1, c2p)

    # ---- BatchNorm pass 2: in-place VPU scale/shift (no GEMM recompute) ----
    yn = _norm_call(y, scale_col, shift_col)                   # (n, hi*wi, c2p) bf16

    # TODO(synk): the phase de-interleave / NCHW repack and the skip concat are still
    # plain XLA; folding them into the normalise kernel needs an NCHW-major out_spec
    # plus input_output_aliases on a pre-allocated concat buffer.
    yn = yn[:, :, :c2].astype(jnp.float32).reshape(n, hi, wi, 2, 2, outer)
    y_nchw = jnp.transpose(yn, (0, 5, 1, 3, 2, 4)).reshape(n, outer, h, w)
    return jnp.concatenate([x, y_nchw], axis=1)


# ---------------- pure-JAX reference (correctness check) ----------------

def reference_forward(x, w_down, w_up, gamma, beta):
    a = jax.nn.elu(x)
    hmid = lax.conv_general_dilated(a, w_down, (2, 2), [(1, 1), (1, 1)],
                                    dimension_numbers=('NCHW', 'OIHW', 'NCHW'),
                                    precision=lax.Precision.HIGHEST)
    hmid = jax.nn.elu(hmid)
    w_up_oihw = jnp.flip(w_up, axis=(2, 3)).transpose(1, 0, 2, 3)
    y = lax.conv_general_dilated(hmid, w_up_oihw, (1, 1), [(2, 2), (2, 2)],
                                 lhs_dilation=(2, 2),
                                 dimension_numbers=('NCHW', 'OIHW', 'NCHW'),
                                 precision=lax.Precision.HIGHEST)
    mean = y.mean(axis=(0, 2, 3), keepdims=True)
    var = ((y - mean) ** 2).mean(axis=(0, 2, 3), keepdims=True)
    y = (y - mean) * lax.rsqrt(var + _EPS)
    y = y * gamma.reshape(1, -1, 1, 1) + beta.reshape(1, -1, 1, 1)
    return jnp.concatenate([x, y], axis=1)


if __name__ == "__main__":
    key = jax.random.PRNGKey(0)
    k1, k2, k3 = jax.random.split(key, 3)

    N, outer_nc, inner_nc, H, W = 2, 4, 8, 16, 16
    input_nc = outer_nc  # input_nc defaults to outer_nc in the module

    x = jax.random.normal(k1, (N, input_nc, H, W), jnp.float32)
    # downconv: Conv2d(input_nc, inner_nc, 4, stride=2, pad=1, bias=False) -> OIHW
    w_down = 0.1 * jax.random.normal(k2, (inner_nc, input_nc, 4, 4), jnp.float32)
    # upconv: ConvTranspose2d(inner_nc, outer_nc, 4, stride=2, pad=1, bias=False)
    w_up = 0.1 * jax.random.normal(k3, (inner_nc, outer_nc, 4, 4), jnp.float32)
    # BatchNorm2d(outer_nc) default affine init
    gamma = jnp.ones((outer_nc,), jnp.float32)
    beta = jnp.zeros((outer_nc,), jnp.float32)

    fwd = jax.jit(unet_innermost_forward)
    out = jax.block_until_ready(fwd(x, w_down, w_up, gamma, beta))
    ref = reference_forward(x, w_down, w_up, gamma, beta)

    assert out.shape == (N, input_nc + outer_nc, H, W), out.shape
    max_err = float(jnp.max(jnp.abs(out - ref)))
    assert jnp.allclose(out, ref, atol=3e-2, rtol=3e-2), f"max abs err = {max_err}"
    print("KERNEL_OK")
</pallas_src>

<mosaic_0001>
module attributes {stable_mosaic.version = 11 : i64} {
  func.func @kernel(%arg0: i32, %arg1: i32, %arg2: memref<1x10x10x128xbf16, #tpu.memory_space<vmem>>, %arg3: memref<9x128x128xbf16, #tpu.memory_space<vmem>>, %arg4: memref<1x64x128xbf16, #tpu.memory_space<vmem>>, %arg5: memref<1x1x128xf32, #tpu.memory_space<vmem>>, %arg6: memref<1x1x128xf32, #tpu.memory_space<vmem>>) attributes {dimension_semantics = [#tpu.dimension_semantics<parallel>, #tpu.dimension_semantics<arbitrary>], iteration_bounds = array<i64: 2, 1>, scalar_prefetch = 0 : i64, scratch_operands = 0 : i64, tpu.core_type = #tpu.core_type<tc>, window_params = [{transform_indices = @transform_0, window_bounds = array<i64: 1, 10, 10, 128>}, {pipeline_mode = #tpu.pipeline_mode<synchronous>, transform_indices = @transform_1, window_bounds = array<i64: 9, 128, 128>}, {transform_indices = @transform_2, window_bounds = array<i64: 1, 64, 128>}, {transform_indices = @transform_3, window_bounds = array<i64: 1, 1, 128>}, {transform_indices = @transform_4, window_bounds = array<i64: 1, 1, 128>}]} {
    %c0_i32 = arith.constant 0 : i32
    %0 = arith.cmpi eq, %arg1, %c0_i32 : i32
    %1 = arith.extui %0 : i1 to i32
    %c0_i32_0 = arith.constant 0 : i32
    %2 = arith.cmpi ne, %1, %c0_i32_0 : i32
    scf.if %2 {
      %cst_57 = arith.constant 0.000000e+00 : f32
      %98 = vector.broadcast %cst_57 : f32 to vector<1x1x128xf32>
      %c0_58 = arith.constant 0 : index
      %c0_59 = arith.constant 0 : index
      %c0_60 = arith.constant 0 : index
      %99 = vector.load %arg5[%c0_58, %c0_59, %c0_60] : memref<1x1x128xf32, #tpu.memory_space<vmem>>, vector<1x1x128xf32>
      tpu.vector_store %arg5[%c0_58, %c0_59, %c0_60], %98 {strides = array<i32>} : memref<1x1x128xf32, #tpu.memory_space<vmem>>, vector<1x1x128xf32>,
      %cst_61 = arith.constant 0.000000e+00 : f32
      %100 = vector.broadcast %cst_61 : f32 to vector<1x1x128xf32>
      %c0_62 = arith.constant 0 : index
      %c0_63 = arith.constant 0 : index
      %c0_64 = arith.constant 0 : index
      %101 = vector.load %arg6[%c0_62, %c0_63, %c0_64] : memref<1x1x128xf32, #tpu.memory_space<vmem>>, vector<1x1x128xf32>
      tpu.vector_store %arg6[%c0_62, %c0_63, %c0_64], %100 {strides = array<i32>} : memref<1x1x128xf32, #tpu.memory_space<vmem>>, vector<1x1x128xf32>,
    } else {
    }
    %cst = arith.constant 0.000000e+00 : f32
    %3 = vector.broadcast %cst : f32 to vector<64x128xf32>
    %c0 = arith.constant 0 : index
    %c0_1 = arith.constant 0 : index
    %c0_2 = arith.constant 0 : index
    %c0_3 = arith.constant 0 : index
    %4 = vector.load %arg2[%c0, %c0_1, %c0_2, %c0_3] : memref<1x10x10x128xbf16, #tpu.memory_space<vmem>>, vector<1x8x10x128xbf16>
    %5 = vector.shape_cast %4 : vector<1x8x10x128xbf16> to vector<8x10x128xbf16>
    %6 = arith.extf %5 : vector<8x10x128xbf16> to vector<8x10x128xf32>
    %7 = vector.extract_strided_slice %6 {offsets = [0, 0, 0], sizes = [8, 8, 128], strides = [1, 1, 1]} : vector<8x10x128xf32> to vector<8x8x128xf32>
    %8 = vector.shape_cast %7 : vector<8x8x128xf32> to vector<64x128xf32>
    %9 = arith.truncf %8 : vector<64x128xf32> to vector<64x128xbf16>
    %c0_4 = arith.constant 0 : index
    %c0_5 = arith.constant 0 : index
    %c0_6 = arith.constant 0 : index
    %10 = vector.load %arg3[%c0_4, %c0_5, %c0_6] : memref<9x128x128xbf16, #tpu.memory_space<vmem>>, vector<1x128x128xbf16>
    %11 = vector.shape_cast %10 : vector<1x128x128xbf16> to vector<128x128xbf16>
    %cst_7 = arith.constant dense<0.000000e+00> : vector<64x128xf32>
    %12 = tpu.matmul %9, %11, %cst_7 {dimension_numbers = #tpu.dot_dimension_numbers<[1], [0], [0], [1], [0, 0, 1, 1], [], []>} : vector<64x128xbf16>, vector<128x128xbf16>, vector<64x128xf32> -> vector<64x128xf32>
    %13 = arith.addf %3, %12 : vector<64x128xf32>
    %14 = vector.extract_strided_slice %6 {offsets = [0, 1, 0], sizes = [8, 8, 128], strides = [1, 1, 1]} : vector<8x10x128xf32> to vector<8x8x128xf32>
    %15 = vector.shape_cast %14 : vector<8x8x128xf32> to vector<64x128xf32>
    %16 = arith.truncf %15 : vector<64x128xf32> to vector<64x128xbf16>
    %c1 = arith.constant 1 : index
    %c0_8 = arith.constant 0 : index
    %c0_9 = arith.constant 0 : index
    %17 = vector.load %arg3[%c1, %c0_8, %c0_9] : memref<9x128x128xbf16, #tpu.memory_space<vmem>>, vector<1x128x128xbf16>
    %18 = vector.shape_cast %17 : vector<1x128x128xbf16> to vector<128x128xbf16>
    %cst_10 = arith.constant dense<0.000000e+00> : vector<64x128xf32>
    %19 = tpu.matmul %16, %18, %cst_10 {dimension_numbers = #tpu.dot_dimension_numbers<[1], [0], [0], [1], [0, 0, 1, 1], [], []>} : vector<64x128xbf16>, vector<128x128xbf16>, vector<64x128xf32> -> vector<64x128xf32>
    %20 = arith.addf %13, %19 : vector<64x128xf32>
    %21 = vector.extract_strided_slice %6 {offsets = [0, 2, 0], sizes = [8, 8, 128], strides = [1, 1, 1]} : vector<8x10x128xf32> to vector<8x8x128xf32>
    %22 = vector.shape_cast %21 : vector<8x8x128xf32> to vector<64x128xf32>
    %23 = arith.truncf %22 : vector<64x128xf32> to vector<64x128xbf16>
    %c2 = arith.constant 2 : index
    %c0_11 = arith.constant 0 : index
    %c0_12 = arith.constant 0 : index
    %24 = vector.load %arg3[%c2, %c0_11, %c0_12] : memref<9x128x128xbf16, #tpu.memory_space<vmem>>, vector<1x128x128xbf16>
    %25 = vector.shape_cast %24 : vector<1x128x128xbf16> to vector<128x128xbf16>
    %cst_13 = arith.constant dense<0.000000e+00> : vector<64x128xf32>
    %26 = tpu.matmul %23, %25, %cst_13 {dimension_numbers = #tpu.dot_dimension_numbers<[1], [0], [0], [1], [0, 0, 1, 1], [], []>} : vector<64x128xbf16>, vector<128x128xbf16>, vector<64x128xf32> -> vector<64x128xf32>
    %27 = arith.addf %20, %26 : vector<64x128xf32>
    %c0_14 = arith.constant 0 : index
    %c1_15 = arith.constant 1 : index
    %c0_16 = arith.constant 0 : index
    %c0_17 = arith.constant 0 : index
    %28 = vector.load %arg2[%c0_14, %c1_15, %c0_16, %c0_17] : memref<1x10x10x128xbf16, #tpu.memory_space<vmem>>, vector<1x8x10x128xbf16>
    %29 = vector.shape_cast %28 : vector<1x8x10x128xbf16> to vector<8x10x128xbf16>
    %30 = arith.extf %29 : vector<8x10x128xbf16> to vector<8x10x128xf32>
    %31 = vector.extract_strided_slice %30 {offsets = [0, 0, 0], sizes = [8, 8, 128], strides = [1, 1, 1]} : vector<8x10x128xf32> to vector<8x8x128xf32>
    %32 = vector.shape_cast %31 : vector<8x8x128xf32> to vector<64x128xf32>
    %33 = arith.truncf %32 : vector<64x128xf32> to vector<64x128xbf16>
    %c3 = arith.constant 3 : index
    %c0_18 = arith.constant 0 : index
    %c0_19 = arith.constant 0 : index
    %34 = vector.load %arg3[%c3, %c0_18, %c0_19] : memref<9x128x128xbf16, #tpu.memory_space<vmem>>, vector<1x128x128xbf16>
    %35 = vector.shape_cast %34 : vector<1x128x128xbf16> to vector<128x128xbf16>
    %cst_20 = arith.constant dense<0.000000e+00> : vector<64x128xf32>
    %36 = tpu.matmul %33, %35, %cst_20 {dimension_numbers = #tpu.dot_dimension_numbers<[1], [0], [0], [1], [0, 0, 1, 1], [], []>} : vector<64x128xbf16>, vector<128x128xbf16>, vector<64x128xf32> -> vector<64x128xf32>
    %37 = arith.addf %27, %36 : vector<64x128xf32>
    %38 = vector.extract_strided_slice %30 {offsets = [0, 1, 0], sizes = [8, 8, 128], strides = [1, 1, 1]} : vector<8x10x128xf32> to vector<8x8x128xf32>
    %39 = vector.shape_cast %38 : vector<8x8x128xf32> to vector<64x128xf32>
    %40 = arith.truncf %39 : vector<64x128xf32> to vector<64x128xbf16>
    %c4 = arith.constant 4 : index
    %c0_21 = arith.constant 0 : index
    %c0_22 = arith.constant 0 : index
    %41 = vector.load %arg3[%c4, %c0_21, %c0_22] : memref<9x128x128xbf16, #tpu.memory_space<vmem>>, vector<1x128x128xbf16>
    %42 = vector.shape_cast %41 : vector<1x128x128xbf16> to vector<128x128xbf16>
    %cst_23 = arith.constant dense<0.000000e+00> : vector<64x128xf32>
    %43 = tpu.matmul %40, %42, %cst_23 {dimension_numbers = #tpu.dot_dimension_numbers<[1], [0], [0], [1], [0, 0, 1, 1], [], []>} : vector<64x128xbf16>, vector<128x128xbf16>, vector<64x128xf32> -> vector<64x128xf32>
    %44 = arith.addf %37, %43 : vector<64x128xf32>
    %45 = vector.extract_strided_slice %30 {offsets = [0, 2, 0], sizes = [8, 8, 128], strides = [1, 1, 1]} : vector<8x10x128xf32> to vector<8x8x128xf32>
    %46 = vector.shape_cast %45 : vector<8x8x128xf32> to vector<64x128xf32>
    %47 = arith.truncf %46 : vector<64x128xf32> to vector<64x128xbf16>
    %c5 = arith.constant 5 : index
    %c0_24 = arith.constant 0 : index
    %c0_25 = arith.constant 0 : index
    %48 = vector.load %arg3[%c5, %c0_24, %c0_25] : memref<9x128x128xbf16, #tpu.memory_space<vmem>>, vector<1x128x128xbf16>
    %49 = vector.shape_cast %48 : vector<1x128x128xbf16> to vector<128x128xbf16>
    %cst_26 = arith.constant dense<0.000000e+00> : vector<64x128xf32>
    %50 = tpu.matmul %47, %49, %cst_26 {dimension_numbers = #tpu.dot_dimension_numbers<[1], [0], [0], [1], [0, 0, 1, 1], [], []>} : vector<64x128xbf16>, vector<128x128xbf16>, vector<64x128xf32> -> vector<64x128xf32>
    %51 = arith.addf %44, %50 : vector<64x128xf32>
    %c0_27 = arith.constant 0 : index
    %c2_28 = arith.constant 2 : index
    %c0_29 = arith.constant 0 : index
    %c0_30 = arith.constant 0 : index
    %52 = vector.load %arg2[%c0_27, %c2_28, %c0_29, %c0_30] : memref<1x10x10x128xbf16, #tpu.memory_space<vmem>>, vector<1x8x10x128xbf16>
    %53 = vector.shape_cast %52 : vector<1x8x10x128xbf16> to vector<8x10x128xbf16>
    %54 = arith.extf %53 : vector<8x10x128xbf16> to vector<8x10x128xf32>
    %55 = vector.extract_strided_slice %54 {offsets = [0, 0, 0], sizes = [8, 8, 128], strides = [1, 1, 1]} : vector<8x10x128xf32> to vector<8x8x128xf32>
    %56 = vector.shape_cast %55 : vector<8x8x128xf32> to vector<64x128xf32>
    %57 = arith.truncf %56 : vector<64x128xf32> to vector<64x128xbf16>
    %c6 = arith.constant 6 : index
    %c0_31 = arith.constant 0 : index
    %c0_32 = arith.constant 0 : index
    %58 = vector.load %arg3[%c6, %c0_31, %c0_32] : memref<9x128x128xbf16, #tpu.memory_space<vmem>>, vector<1x128x128xbf16>
    %59 = vector.shape_cast %58 : vector<1x128x128xbf16> to vector<128x128xbf16>
    %cst_33 = arith.constant dense<0.000000e+00> : vector<64x128xf32>
    %60 = tpu.matmul %57, %59, %cst_33 {dimension_numbers = #tpu.dot_dimension_numbers<[1], [0], [0], [1], [0, 0, 1, 1], [], []>} : vector<64x128xbf16>, vector<128x128xbf16>, vector<64x128xf32> -> vector<64x128xf32>
    %61 = arith.addf %51, %60 : vector<64x128xf32>
    %62 = vector.extract_strided_slice %54 {offsets = [0, 1, 0], sizes = [8, 8, 128], strides = [1, 1, 1]} : vector<8x10x128xf32> to vector<8x8x128xf32>
    %63 = vector.shape_cast %62 : vector<8x8x128xf32> to vector<64x128xf32>
    %64 = arith.truncf %63 : vector<64x128xf32> to vector<64x128xbf16>
    %c7 = arith.constant 7 : index
    %c0_34 = arith.constant 0 : index
    %c0_35 = arith.constant 0 : index
    %65 = vector.load %arg3[%c7, %c0_34, %c0_35] : memref<9x128x128xbf16, #tpu.memory_space<vmem>>, vector<1x128x128xbf16>
    %66 = vector.shape_cast %65 : vector<1x128x128xbf16> to vector<128x128xbf16>
    %cst_36 = arith.constant dense<0.000000e+00> : vector<64x128xf32>
    %67 = tpu.matmul %64, %66, %cst_36 {dimension_numbers = #tpu.dot_dimension_numbers<[1], [0], [0], [1], [0, 0, 1, 1], [], []>} : vector<64x128xbf16>, vector<128x128xbf16>, vector<64x128xf32> -> vector<64x128xf32>
    %68 = arith.addf %61, %67 : vector<64x128xf32>
    %69 = vector.extract_strided_slice %54 {offsets = [0, 2, 0], sizes = [8, 8, 128], strides = [1, 1, 1]} : vector<8x10x128xf32> to vector<8x8x128xf32>
    %70 = vector.shape_cast %69 : vector<8x8x128xf32> to vector<64x128xf32>
    %71 = arith.truncf %70 : vector<64x128xf32> to vector<64x128xbf16>
    %c8 = arith.constant 8 : index
    %c0_37 = arith.constant 0 : index
    %c0_38 = arith.constant 0 : index
    %72 = vector.load %arg3[%c8, %c0_37, %c0_38] : memref<9x128x128xbf16, #tpu.memory_space<vmem>>, vector<1x128x128xbf16>
    %73 = vector.shape_cast %72 : vector<1x128x128xbf16> to vector<128x128xbf16>
    %cst_39 = arith.constant dense<0.000000e+00> : vector<64x128xf32>
    %74 = tpu.matmul %71, %73, %cst_39 {dimension_numbers = #tpu.dot_dimension_numbers<[1], [0], [0], [1], [0, 0, 1, 1], [], []>} : vector<64x128xbf16>, vector<128x128xbf16>, vector<64x128xf32> -> vector<64x128xf32>
    %75 = arith.addf %68, %74 : vector<64x128xf32>
    %76 = arith.truncf %75 : vector<64x128xf32> to vector<64x128xbf16>
    %c0_40 = arith.constant 0 : index
    %c0_41 = arith.constant 0 : index
    %c0_42 = arith.constant 0 : index
    %77 = vector.load %arg4[%c0_40, %c0_41, %c0_42] : memref<1x64x128xbf16, #tpu.memory_space<vmem>>, vector<1x64x128xbf16>
    %78 = vector.shape_cast %77 : vector<1x64x128xbf16> to vector<64x128xbf16>
    %79 = vector.shape_cast %76 : vector<64x128xbf16> to vector<1x64x128xbf16>
    tpu.vector_store %arg4[%c0_40, %c0_41, %c0_42], %79 {strides = array<i32>} : memref<1x64x128xbf16, #tpu.memory_space<vmem>>, vector<1x64x128xbf16>,
    %80 = arith.extf %76 : vector<64x128xbf16> to vector<64x128xf32>
    %c0_43 = arith.constant 0 : index
    %c0_44 = arith.constant 0 : index
    %c0_45 = arith.constant 0 : index
    %81 = vector.load %arg5[%c0_43, %c0_44, %c0_45] : memref<1x1x128xf32, #tpu.memory_space<vmem>>, vector<1x1x128xf32>
    %82 = vector.shape_cast %81 : vector<1x1x128xf32> to vector<1x128xf32>
    %cst_46 = arith.constant dense<0.000000e+00> : vector<128xf32>
    %83 = vector.multi_reduction <add>, %80, %cst_46 [0] : vector<64x128xf32> to vector<128xf32>
    %84 = vector.shape_cast %83 : vector<128xf32> to vector<1x128xf32>
    %85 = arith.addf %82, %84 : vector<1x128xf32>
    %c0_47 = arith.constant 0 : index
    %c0_48 = arith.constant 0 : index
    %c0_49 = arith.constant 0 : index
    %86 = vector.load %arg5[%c0_47, %c0_48, %c0_49] : memref<1x1x128xf32, #tpu.memory_space<vmem>>, vector<1x1x128xf32>
    %87 = vector.shape_cast %86 : vector<1x1x128xf32> to vector<1x128xf32>
    %88 = vector.shape_cast %85 : vector<1x128xf32> to vector<1x1x128xf32>
    tpu.vector_store %arg5[%c0_47, %c0_48, %c0_49], %88 {strides = array<i32>} : memref<1x1x128xf32, #tpu.memory_space<vmem>>, vector<1x1x128xf32>,
    %c0_50 = arith.constant 0 : index
    %c0_51 = arith.constant 0 : index
    %c0_52 = arith.constant 0 : index
    %89 = vector.load %arg6[%c0_50, %c0_51, %c0_52] : memref<1x1x128xf32, #tpu.memory_space<vmem>>, vector<1x1x128xf32>
    %90 = vector.shape_cast %89 : vector<1x1x128xf32> to vector<1x128xf32>
    %91 = arith.mulf %80, %80 : vector<64x128xf32>
    %cst_53 = arith.constant dense<0.000000e+00> : vector<128xf32>
    %92 = vector.multi_reduction <add>, %91, %cst_53 [0] : vector<64x128xf32> to vector<128xf32>
    %93 = vector.shape_cast %92 : vector<128xf32> to vector<1x128xf32>
    %94 = arith.addf %90, %93 : vector<1x128xf32>
    %c0_54 = arith.constant 0 : index
    %c0_55 = arith.constant 0 : index
    %c0_56 = arith.constant 0 : index
    %95 = vector.load %arg6[%c0_54, %c0_55, %c0_56] : memref<1x1x128xf32, #tpu.memory_space<vmem>>, vector<1x1x128xf32>
    %96 = vector.shape_cast %95 : vector<1x1x128xf32> to vector<1x128xf32>
    %97 = vector.shape_cast %94 : vector<1x128xf32> to vector<1x1x128xf32>
    tpu.vector_store %arg6[%c0_54, %c0_55, %c0_56], %97 {strides = array<i32>} : memref<1x1x128xf32, #tpu.memory_space<vmem>>, vector<1x1x128xf32>,
    return
  }
  func.func @transform_0(%arg0: i32, %arg1: i32) -> (i32, i32, i32, i32) {
    %c1_i32 = arith.constant 1 : i32
    %0 = arith.muli %arg0, %c1_i32 : i32
    %1 = arith.addi %0, %arg1 : i32
    %c0_i32 = arith.constant 0 : i32
    %c0_i32_0 = arith.constant 0 : i32
    %c0_i32_1 = arith.constant 0 : i32
    %c0_i32_2 = arith.constant 0 : i32
    return %1, %c0_i32, %c0_i32_0, %c0_i32_1 : i32, i32, i32, i32
  }
  func.func @transform_1(%arg0: i32, %arg1: i32) -> (i32, i32, i32) {
    %c0_i32 = arith.constant 0 : i32
    %c0_i32_0 = arith.constant 0 : i32
    %c0_i32_1 = arith.constant 0 : i32
    %c0_i32_2 = arith.constant 0 : i32
    return %c0_i32, %c0_i32_0, %c0_i32_1 : i32, i32, i32
  }
  func.func @transform_2(%arg0: i32, %arg1: i32) -> (i32, i32, i32) {
    %c1_i32 = arith.constant 1 : i32
    %0 = arith.muli %arg0, %c1_i32 : i32
    %1 = arith.addi %0, %arg1 : i32
    %c0_i32 = arith.constant 0 : i32
    %c0_i32_0 = arith.constant 0 : i32
    %c0_i32_1 = arith.constant 0 : i32
    return %1, %c0_i32, %c0_i32_0 : i32, i32, i32
  }
  func.func @transform_3(%arg0: i32, %arg1: i32) -> (i32, i32, i32) {
    %c0_i32 = arith.constant 0 : i32
    %c0_i32_0 = arith.constant 0 : i32
    %c0_i32_1 = arith.constant 0 : i32
    return %arg0, %c0_i32, %c0_i32_0 : i32, i32, i32
  }
  func.func @transform_4(%arg0: i32, %arg1: i32) -> (i32, i32, i32) {
    %c0_i32 = arith.constant 0 : i32
    %c0_i32_0 = arith.constant 0 : i32
    %c0_i32_1 = arith.constant 0 : i32
    return %arg0, %c0_i32, %c0_i32_0 : i32, i32, i32
  }
}

module attributes {stable_mosaic.version = 11 : i64} {
  func.func @kernel(%arg0: i32, %arg1: memref<1x9x9x16xbf16, #tpu.memory_space<vmem>>, %arg2: memref<4x16x128xbf16, #tpu.memory_space<vmem>>, %arg3: memref<1x64x128xbf16, #tpu.memory_space<vmem>>) attributes {dimension_semantics = [#tpu.dimension_semantics<parallel>], iteration_bounds = array<i64: 2>, scalar_prefetch = 0 : i64, scratch_operands = 0 : i64, tpu.core_type = #tpu.core_type<tc>, window_params = [{transform_indices = @transform_0, window_bounds = array<i64: 1, 9, 9, 16>}, {pipeline_mode = #tpu.pipeline_mode<synchronous>, transform_indices = @transform_1, window_bounds = array<i64: 4, 16, 128>}, {transform_indices = @transform_2, window_bounds = array<i64: 1, 64, 128>}]} {
    %cst = arith.constant 0.000000e+00 : f32
    %0 = vector.broadcast %cst : f32 to vector<64x128xf32>
    %c0 = arith.constant 0 : index
    %c0_0 = arith.constant 0 : index
    %c0_1 = arith.constant 0 : index
    %c0_2 = arith.constant 0 : index
    %1 = vector.load %arg1[%c0, %c0_0, %c0_1, %c0_2] : memref<1x9x9x16xbf16, #tpu.memory_space<vmem>>, vector<1x8x9x16xbf16>
    %2 = vector.shape_cast %1 : vector<1x8x9x16xbf16> to vector<8x9x16xbf16>
    %3 = arith.extf %2 : vector<8x9x16xbf16> to vector<8x9x16xf32>
    %4 = vector.extract_strided_slice %3 {offsets = [0, 0, 0], sizes = [8, 8, 16], strides = [1, 1, 1]} : vector<8x9x16xf32> to vector<8x8x16xf32>
    %5 = vector.shape_cast %4 : vector<8x8x16xf32> to vector<64x16xf32>
    %6 = arith.truncf %5 : vector<64x16xf32> to vector<64x16xbf16>
    %c0_3 = arith.constant 0 : index
    %c0_4 = arith.constant 0 : index
    %c0_5 = arith.constant 0 : index
    %7 = vector.load %arg2[%c0_3, %c0_4, %c0_5] : memref<4x16x128xbf16, #tpu.memory_space<vmem>>, vector<1x16x128xbf16>
    %8 = vector.shape_cast %7 : vector<1x16x128xbf16> to vector<16x128xbf16>
    %cst_6 = arith.constant dense<0.000000e+00> : vector<64x128xf32>
    %9 = tpu.matmul %6, %8, %cst_6 {dimension_numbers = #tpu.dot_dimension_numbers<[1], [0], [0], [1], [0, 0, 1, 1], [], []>} : vector<64x16xbf16>, vector<16x128xbf16>, vector<64x128xf32> -> vector<64x128xf32>
    %10 = arith.addf %0, %9 : vector<64x128xf32>
    %11 = vector.extract_strided_slice %3 {offsets = [0, 1, 0], sizes = [8, 8, 16], strides = [1, 1, 1]} : vector<8x9x16xf32> to vector<8x8x16xf32>
    %12 = vector.shape_cast %11 : vector<8x8x16xf32> to vector<64x16xf32>
    %13 = arith.truncf %12 : vector<64x16xf32> to vector<64x16xbf16>
    %c1 = arith.constant 1 : index
    %c0_7 = arith.constant 0 : index
    %c0_8 = arith.constant 0 : index
    %14 = vector.load %arg2[%c1, %c0_7, %c0_8] : memref<4x16x128xbf16, #tpu.memory_space<vmem>>, vector<1x16x128xbf16>
    %15 = vector.shape_cast %14 : vector<1x16x128xbf16> to vector<16x128xbf16>
    %cst_9 = arith.constant dense<0.000000e+00> : vector<64x128xf32>
    %16 = tpu.matmul %13, %15, %cst_9 {dimension_numbers = #tpu.dot_dimension_numbers<[1], [0], [0], [1], [0, 0, 1, 1], [], []>} : vector<64x16xbf16>, vector<16x128xbf16>, vector<64x128xf32> -> vector<64x128xf32>
    %17 = arith.addf %10, %16 : vector<64x128xf32>
    %c0_10 = arith.constant 0 : index
    %c1_11 = arith.constant 1 : index
    %c0_12 = arith.constant 0 : index
    %c0_13 = arith.constant 0 : index
    %18 = vector.load %arg1[%c0_10, %c1_11, %c0_12, %c0_13] : memref<1x9x9x16xbf16, #tpu.memory_space<vmem>>, vector<1x8x9x16xbf16>
    %19 = vector.shape_cast %18 : vector<1x8x9x16xbf16> to vector<8x9x16xbf16>
    %20 = arith.extf %19 : vector<8x9x16xbf16> to vector<8x9x16xf32>
    %21 = vector.extract_strided_slice %20 {offsets = [0, 0, 0], sizes = [8, 8, 16], strides = [1, 1, 1]} : vector<8x9x16xf32> to vector<8x8x16xf32>
    %22 = vector.shape_cast %21 : vector<8x8x16xf32> to vector<64x16xf32>
    %23 = arith.truncf %22 : vector<64x16xf32> to vector<64x16xbf16>
    %c2 = arith.constant 2 : index
    %c0_14 = arith.constant 0 : index
    %c0_15 = arith.constant 0 : index
    %24 = vector.load %arg2[%c2, %c0_14, %c0_15] : memref<4x16x128xbf16, #tpu.memory_space<vmem>>, vector<1x16x128xbf16>
    %25 = vector.shape_cast %24 : vector<1x16x128xbf16> to vector<16x128xbf16>
    %cst_16 = arith.constant dense<0.000000e+00> : vector<64x128xf32>
    %26 = tpu.matmul %23, %25, %cst_16 {dimension_numbers = #tpu.dot_dimension_numbers<[1], [0], [0], [1], [0, 0, 1, 1], [], []>} : vector<64x16xbf16>, vector<16x128xbf16>, vector<64x128xf32> -> vector<64x128xf32>
    %27 = arith.addf %17, %26 : vector<64x128xf32>
    %28 = vector.extract_strided_slice %20 {offsets = [0, 1, 0], sizes = [8, 8, 16], strides = [1, 1, 1]} : vector<8x9x16xf32> to vector<8x8x16xf32>
    %29 = vector.shape_cast %28 : vector<8x8x16xf32> to vector<64x16xf32>
    %30 = arith.truncf %29 : vector<64x16xf32> to vector<64x16xbf16>
    %c3 = arith.constant 3 : index
    %c0_17 = arith.constant 0 : index
    %c0_18 = arith.constant 0 : index
    %31 = vector.load %arg2[%c3, %c0_17, %c0_18] : memref<4x16x128xbf16, #tpu.memory_space<vmem>>, vector<1x16x128xbf16>
    %32 = vector.shape_cast %31 : vector<1x16x128xbf16> to vector<16x128xbf16>
    %cst_19 = arith.constant dense<0.000000e+00> : vector<64x128xf32>
    %33 = tpu.matmul %30, %32, %cst_19 {dimension_numbers = #tpu.dot_dimension_numbers<[1], [0], [0], [1], [0, 0, 1, 1], [], []>} : vector<64x16xbf16>, vector<16x128xbf16>, vector<64x128xf32> -> vector<64x128xf32>
    %34 = arith.addf %27, %33 : vector<64x128xf32>
    %cst_20 = arith.constant 0.000000e+00 : f32
    %35 = vector.broadcast %cst_20 : f32 to vector<64x128xf32>
    %36 = arith.cmpf ogt, %34, %35 : vector<64x128xf32>
    %cst_21 = arith.constant 0.000000e+00 : f32
    %37 = vector.broadcast %cst_21 : f32 to vector<64x128xf32>
    %38 = arith.minimumf %34, %37 : vector<64x128xf32>
    %39 = math.exp %38 : vector<64x128xf32>
    %cst_22 = arith.constant 1.000000e+00 : f32
    %40 = vector.broadcast %cst_22 : f32 to vector<64x128xf32>
    %41 = arith.subf %39, %40 : vector<64x128xf32>
    %42 = arith.select %36, %34, %41 : vector<64x128xi1>, vector<64x128xf32>
    %43 = arith.truncf %42 : vector<64x128xf32> to vector<64x128xbf16>
    %c0_23 = arith.constant 0 : index
    %c0_24 = arith.constant 0 : index
    %c0_25 = arith.constant 0 : index
    %44 = vector.load %arg3[%c0_23, %c0_24, %c0_25] : memref<1x64x128xbf16, #tpu.memory_space<vmem>>, vector<1x64x128xbf16>
    %45 = vector.shape_cast %44 : vector<1x64x128xbf16> to vector<64x128xbf16>
    %46 = vector.shape_cast %43 : vector<64x128xbf16> to vector<1x64x128xbf16>
    tpu.vector_store %arg3[%c0_23, %c0_24, %c0_25], %46 {strides = array<i32>} : memref<1x64x128xbf16, #tpu.memory_space<vmem>>, vector<1x64x128xbf16>,
    return
  }
  func.func @transform_0(%arg0: i32) -> (i32, i32, i32, i32) {
    %c0_i32 = arith.constant 0 : i32
    %c0_i32_0 = arith.constant 0 : i32
    %c0_i32_1 = arith.constant 0 : i32
    %c0_i32_2 = arith.constant 0 : i32
    return %arg0, %c0_i32, %c0_i32_0, %c0_i32_1 : i32, i32, i32, i32
  }
  func.func @transform_1(%arg0: i32) -> (i32, i32, i32) {
    %c0_i32 = arith.constant 0 : i32
    %c0_i32_0 = arith.constant 0 : i32
    %c0_i32_1 = arith.constant 0 : i32
    %c0_i32_2 = arith.constant 0 : i32
    return %c0_i32, %c0_i32_0, %c0_i32_1 : i32, i32, i32
  }
  func.func @transform_2(%arg0: i32) -> (i32, i32, i32) {
    %c0_i32 = arith.constant 0 : i32
    %c0_i32_0 = arith.constant 0 : i32
    %c0_i32_1 = arith.constant 0 : i32
    return %arg0, %c0_i32, %c0_i32_0 : i32, i32, i32
  }
}

module attributes {stable_mosaic.version = 11 : i64} {
  func.func @_norm_kernel(%arg0: i32, %arg1: memref<1x64x128xbf16, #tpu.memory_space<vmem>>, %arg2: memref<1x128xf32, #tpu.memory_space<vmem>>, %arg3: memref<1x128xf32, #tpu.memory_space<vmem>>, %arg4: memref<1x64x128xbf16, #tpu.memory_space<vmem>>) attributes {dimension_semantics = [#tpu.dimension_semantics<parallel>], iteration_bounds = array<i64: 2>, scalar_prefetch = 0 : i64, scratch_operands = 0 : i64, tpu.core_type = #tpu.core_type<tc>, window_params = [{transform_indices = @transform_0, window_bounds = array<i64: 1, 64, 128>}, {pipeline_mode = #tpu.pipeline_mode<synchronous>, transform_indices = @transform_1, window_bounds = array<i64: 1, 128>}, {pipeline_mode = #tpu.pipeline_mode<synchronous>, transform_indices = @transform_2, window_bounds = array<i64: 1, 128>}, {transform_indices = @transform_3, window_bounds = array<i64: 1, 64, 128>}]} {
    %c0 = arith.constant 0 : index
    %c0_0 = arith.constant 0 : index
    %c0_1 = arith.constant 0 : index
    %0 = vector.load %arg1[%c0, %c0_0, %c0_1] : memref<1x64x128xbf16, #tpu.memory_space<vmem>>, vector<1x64x128xbf16>
    %1 = vector.shape_cast %0 : vector<1x64x128xbf16> to vector<64x128xbf16>
    %2 = arith.extf %1 : vector<64x128xbf16> to vector<64x128xf32>
    %c0_2 = arith.constant 0 : index
    %c0_3 = arith.constant 0 : index
    %3 = vector.load %arg2[%c0_2, %c0_3] : memref<1x128xf32, #tpu.memory_space<vmem>>, vector<1x128xf32>
    %4 = vector.broadcast %3 : vector<1x128xf32> to vector<64x128xf32>
    %5 = arith.mulf %2, %4 : vector<64x128xf32>
    %c0_4 = arith.constant 0 : index
    %c0_5 = arith.constant 0 : index
    %6 = vector.load %arg3[%c0_4, %c0_5] : memref<1x128xf32, #tpu.memory_space<vmem>>, vector<1x128xf32>
    %7 = vector.broadcast %6 : vector<1x128xf32> to vector<64x128xf32>
    %8 = arith.addf %5, %7 : vector<64x128xf32>
    %9 = arith.truncf %8 : vector<64x128xf32> to vector<64x128xbf16>
    %c0_6 = arith.constant 0 : index
    %c0_7 = arith.constant 0 : index
    %c0_8 = arith.constant 0 : index
    %10 = vector.load %arg4[%c0_6, %c0_7, %c0_8] : memref<1x64x128xbf16, #tpu.memory_space<vmem>>, vector<1x64x128xbf16>
    %11 = vector.shape_cast %10 : vector<1x64x128xbf16> to vector<64x128xbf16>
    %12 = vector.shape_cast %9 : vector<64x128xbf16> to vector<1x64x128xbf16>
    tpu.vector_store %arg4[%c0_6, %c0_7, %c0_8], %12 {strides = array<i32>} : memref<1x64x128xbf16, #tpu.memory_space<vmem>>, vector<1x64x128xbf16>,
    return
  }
  func.func @transform_0(%arg0: i32) -> (i32, i32, i32) {
    %c0_i32 = arith.constant 0 : i32
    %c0_i32_0 = arith.constant 0 : i32
    %c0_i32_1 = arith.constant 0 : i32
    return %arg0, %c0_i32, %c0_i32_0 : i32, i32, i32
  }
  func.func @transform_1(%arg0: i32) -> (i32, i32) {
    %c0_i32 = arith.constant 0 : i32
    %c0_i32_0 = arith.constant 0 : i32
    %c0_i32_1 = arith.constant 0 : i32
    return %c0_i32, %c0_i32_0 : i32, i32
  }
  func.func @transform_2(%arg0: i32) -> (i32, i32) {
    %c0_i32 = arith.constant 0 : i32
    %c0_i32_0 = arith.constant 0 : i32
    %c0_i32_1 = arith.constant 0 : i32
    return %c0_i32, %c0_i32_0 : i32, i32
  }
  func.func @transform_3(%arg0: i32) -> (i32, i32, i32) {
    %c0_i32 = arith.constant 0 : i32
    %c0_i32_0 = arith.constant 0 : i32
    %c0_i32_1 = arith.constant 0 : i32
    return %arg0, %c0_i32, %c0_i32_0 : i32, i32, i32
  }
}

</mosaic_0001>

<bundles_post_ra>
// kernel: tile.13
= control target key start
LH: loop header
LB: loop body
LE: loop exit
PB: predicated region body
PF: predicated region fallthrough
CT: control target
= control target key end

     0   :  { %s22_s0 = inlined_call_operand.vmem [shape: f32[4], index: 0, kind: input, shape index: {}]   ;;  %s23_s1 = inlined_call_operand.vmem [shape: f32[4,4], index: 1, kind: output, shape index: {}]  }
   0x1   :  { %v4_v0 = vld [vmem:[%s22_s0] ss:$0 sm:$0xff] }
   0x2   :  { %5 = vst [vmem:[%s23_s1] sm:$0xf] %v4_v0 }

// kernel: tile.14
= control target key start
LH: loop header
LB: loop body
LE: loop exit
PB: predicated region body
PF: predicated region fallthrough
CT: control target
= control target key end

     0   :  { %vm8_vm0 = vcmask 31744   ;;  %s40_s8 = smov 4   ;;  %s41_s9 = smov 8   ;;  %vm14_vm1 = vcmask 130144   ;;  %vm20_vm2 = vcmask 97344   ;;  %vm26_vm3 = vcmask 64544   ;;  %s58_s0 = inlined_call_operand.vmem [shape: f32[4,4], index: 0, kind: input, shape index: {}]   ;;  %s59_s1 = inlined_call_operand.vmem [shape: f32[16], index: 1, kind: output, shape index: {}]  }
   0x1   :  { %v5_v0 = vld [vmem:[%s58_s0] sm:$0xf]  ;;  %s39_s0 = smov 12  }
   0x2   :  { %6 = vst [vmem:[#allocation1] sm:$0xf] %v5_v0 }
   0x9   :  { %v11_v1 = vld [vmem:[#allocation1 + $0x3] sm:$0x1]   ;;  %v23_v2 = vld [vmem:[#allocation1 + $0x1] sm:$0x1]   ;;  %v7_v3 = vld [vmem:[#allocation1] sm:$0x1]  }
   0xa   :  { %12 = vrot.lane.b32.xlu0 %v11_v1, %s39_s0  ;;  %24 = vrot.lane.b32.xlu1 %v23_v2, %s40_s8  ;;  %v17_v4 = vld [vmem:[#allocation1 + $0x2] sm:$0x1]   ;;  %9 = vst.msk [vmem:[#allocation0] sm:$0x1] %vm8_vm0, %v7_v3  }
   0xe   :  { %18 = vrot.lane.b32.xlu0 %v17_v4, %s41_s9 }
  0x7c   :  { %v13_v5 = vpop.permute.xlu0 %12   ;;  %v25_v6 = vpop.permute.xlu1 %24  }
  0x7d   :  { %15 = vst.msk [vmem:[#allocation0] sm:$0x1] %vm14_vm1, %v13_v5  }
  0x80   :  { %v19_v7 = vpop.permute.xlu0 %18  }
  0x81   :  { %21 = vst.msk [vmem:[#allocation0] sm:$0x1] %vm20_vm2, %v19_v7  }
  0x82   :  { %27 = vst.msk [vmem:[#allocation0] sm:$0x1] %vm26_vm3, %v25_v6  }
  0x89   :  { %v32_v8 = vld [vmem:[#allocation0] sm:$0x1] }
  0x8a   :  { %35 = vst [vmem:[%s59_s1] sm:$0x1] %v32_v8 }

// kernel: unet_innermost_forward.3
= control target key start
LH: loop header
LB: loop body
LE: loop exit
PB: predicated region body
PF: predicated region fallthrough
CT: control target
= control target key end

     0   :  { %s1054_s9 = smov 0   ;;  %s1183_s0 = inlined_call_operand.vmem [shape: bf16[2,9,9,16], index: 0, kind: input, shape index: {}]   ;;  %s1184_s1 = inlined_call_operand.vmem [shape: bf16[4,16,128], index: 1, kind: input, shape index: {}]   ;;  %s1185_s2 = inlined_call_operand.vmem [shape: bf16[2,64,128], index: 2, kind: output, shape index: {}]  }
   0x1 LB: > { %s826_s10 = sadd.s32 4294967295, %s1037_s9   ;;  %p830_p0 = scmp.ge.s32.totalorder %s1037_s9, 1  ;;  %s1037_s9 = sphi %s1054_s9, %s12_s9  }
   0x2   : > { %p112_p1 = scmp.lt.s32.totalorder %s1037_s9, 3 }
   0x4   : > { %p113_p2 = pnand %p830_p0, %p112_p1 }
   0x5   : > { %p134_p3 = scmp.lt.s32.totalorder (!%p113_p2), %s826_s10, 1 }
   0x6   : > { %116 = sbr.rel (%p113_p2) target bundleno = 277 (0x115), region = 28 }
   0xb   : > { %v1003_v0 = vld [vmem:[%s1184_s1] sm:$0xff]   ;;  %v1004_v1 = vld [vmem:[%s1184_s1 + $0x8] sm:$0xff]   ;;  %s1187_s10 = smov (!%p134_p3, %s826_s10), 1  ;;  %v1073_v2 = vld [vmem:[%s1184_s1 + $0x10] sm:$0xff]   ;;  %vm245_vm0 = vcmask 130048   ;;  %vm199_vm1 = vcmask 1046528  }
   0xc   : > { %964 = vmatprep.subr.bf16.mxu1 %v1003_v0  ;;  %954 = vmatprep.subr.bf16.mxu0 %v1004_v1  ;;  %s994_s17 = smul.u32 72, %s1187_s10  ;;  %v1008_v3 = vld [vmem:[%s1184_s1 + $0x18] sm:$0xff]   ;;  %s902_s23 = sshll.u32 %s1187_s10, 5 }
   0xd   : > { %965 = vmatpush3.bf16.msra.mxu1 %v1003_v0  ;;  %955 = vmatpush3.bf16.msra.mxu0 %v1004_v1  ;;  %s143_s26 = scalar_lea.vmem %s1185_s2, %s902_s23 }
   0xe   : > { %974 = vmatprep.subr.bf16.mxu0 %v1073_v2  ;;  %s1083_s22 = scalar_lea.vmem %s1183_s0, %s994_s17  ;;  %984 = vmatprep.subr.bf16.mxu1 %v1008_v3 }
   0xf   : > { %v145_v4 = vld [vmem:[%s1083_s22] sm:$0xf]  ;;  %v147_v5 = vld [vmem:[%s1083_s22 + $0x8] sm:$0xf]  ;;  %v149_v6 = vld [vmem:[%s1083_s22 + $0x10] sm:$0xf] }
  0x10   : > { %v161_v7 = vunpack.c.l.bf16 %v145_v4  ;;  %v163_v8 = vunpack.c.l.bf16 %v147_v5  ;;  %v834_v9 = vcombine.low %v145_v4, %v147_v5  ;;  %v151_v10 = vld [vmem:[%s1083_s22 + $0x18] sm:$0xf]  ;;  %v165_v11 = vunpack.c.l.bf16 %v149_v6  ;;  %v146_v12 = vld [vmem:[%s1083_s22 + $0x4] sm:$0x1]  ;;  %v148_v13 = vld [vmem:[%s1083_s22 + $0xc] sm:$0x1] }
  0x11   : > { %v167_v14 = vunpack.c.l.bf16 %v151_v10  ;;  %v835_v15 = vcombine.low %v149_v6, %v151_v10  ;;  %v162_v16 = vunpack.c.l.bf16 %v146_v12  ;;  %v164_v17 = vunpack.c.l.bf16 %v148_v13  ;;  %v150_v18 = vld [vmem:[%s1083_s22 + $0x14] sm:$0x1]  ;;  %v152_v19 = vld [vmem:[%s1083_s22 + $0x1c] sm:$0x1]  ;;  %v153_v20 = vld [vmem:[%s1083_s22 + $0x20] sm:$0xf] }
  0x12   : > { %v200_v21 = vrot.slane %v161_v7, 1  ;;  %v203_v22 = vrot.slane %v163_v8, 1  ;;  %966 = vmatprep.mubr.msk.bf16.mxu1 %vm245_vm0, %v834_v9  ;;  %v206_v23 = vrot.slane %v165_v11, 1  ;;  %v166_v24 = vunpack.c.l.bf16 %v150_v18  ;;  %v155_v25 = vld [vmem:[%s1083_s22 + $0x28] sm:$0xf] }
  0x13   : > { %v209_v26 = vrot.slane %v167_v14, 1  ;;  %967 = vmatmul.mubr.msk.bf16.vlgmr.msra.gmra.mxu1 %vm245_vm0, %v835_v15  ;;  %v201_v27 = vrot.slane %v162_v16, 1  ;;  %v204_v28 = vrot.slane %v164_v17, 1  ;;  %v168_v29 = vunpack.c.l.bf16 %v152_v19  ;;  %v157_v30 = vld [vmem:[%s1083_s22 + $0x30] sm:$0xf] }
  0x14   : > { %v207_v31 = vrot.slane %v166_v24, 1  ;;  %985 = vmatpush3.bf16.msra.mxu1 %v1008_v3  ;;  %v169_v32 = vunpack.c.l.bf16 %v153_v20  ;;  %v171_v33 = vunpack.c.l.bf16 %v155_v25  ;;  %v836_v34 = vcombine.low %v153_v20, %v155_v25  ;;  %v159_v35 = vld [vmem:[%s1083_s22 + $0x38] sm:$0xf]  ;;  %v154_v36 = vld [vmem:[%s1083_s22 + $0x24] sm:$0x1] }
  0x15   : > { %v202_v37 = vsel %vm199_vm1, %v200_v21, %v201_v27  ;;  %v205_v38 = vsel %vm199_vm1, %v203_v22, %v204_v28  ;;  %v210_v39 = vrot.slane %v168_v29, 1  ;;  %v173_v40 = vunpack.c.l.bf16 %v157_v30  ;;  %v156_v41 = vld [vmem:[%s1083_s22 + $0x2c] sm:$0x1]  ;;  %v158_v42 = vld [vmem:[%s1083_s22 + $0x34] sm:$0x1] }
  0x16   : > { %v232_v43 = vpack.c.bf16 %v205_v38, %v202_v37  ;;  %v208_v44 = vsel %vm199_vm1, %v206_v23, %v207_v31  ;;  %v212_v45 = vrot.slane %v169_v32, 1  ;;  %v215_v46 = vrot.slane %v171_v33, 1  ;;  %970 = vmatprep.mubr.msk.bf16.mxu1 %vm245_vm0, %v836_v34  ;;  %v160_v47 = vld [vmem:[%s1083_s22 + $0x3c] sm:$0x1]  ;;  %v1108_v48 = vld [vmem:[%s1083_s22 + $0x8] sm:$0xf] }
  0x17   : > { %v211_v49 = vsel %vm199_vm1, %v209_v26, %v210_v39  ;;  %v175_v50 = vunpack.c.l.bf16 %v159_v35  ;;  %v837_v51 = vcombine.low %v157_v30, %v159_v35  ;;  %v218_v52 = vrot.slane %v173_v40, 1  ;;  %v851_v53 = vld [vmem:[%s1083_s22 + $0xc] sm:$0x1]  ;;  %v1113_v54 = vld [vmem:[%s1083_s22 + $0x10] sm:$0xf] }
  0x18   : > { %956 = vmatprep.mubr.msk.bf16.mxu0 %vm245_vm0, %v232_v43  ;;  %v233_v55 = vpack.c.bf16 %v211_v49, %v208_v44  ;;  %v170_v56 = vunpack.c.l.bf16 %v154_v36  ;;  %v172_v57 = vunpack.c.l.bf16 %v156_v41  ;;  %v174_v58 = vunpack.c.l.bf16 %v158_v42  ;;  %v853_v59 = vld [vmem:[%s1083_s22 + $0x14] sm:$0x1]  ;;  %v1119_v0 = vld [vmem:[%s1083_s22 + $0x18] sm:$0xf]  ;;  %v855_v6 = vld [vmem:[%s1083_s22 + $0x1c] sm:$0x1] }
  0x19   : > { %v221_v60 = vrot.slane %v175_v50, 1  ;;  %v176_v61 = vunpack.c.l.bf16 %v160_v47  ;;  %v423_v62 = vunpack.c.l.bf16 %v1108_v48  ;;  %v424_v63 = vunpack.c.l.bf16 %v851_v53  ;;  %v1127_v11 = vld [vmem:[%s1083_s22 + $0x20] sm:$0xf]  ;;  %v857_v16 = vld [vmem:[%s1083_s22 + $0x24] sm:$0x1] }
  0x1a   : > { %957 = vmatmul.mubr.msk.bf16.vlgmr.msra.gmra.mxu0 %vm245_vm0, %v233_v55  ;;  %v213_v1 = vrot.slane %v170_v56, 1  ;;  %v216_v3 = vrot.slane %v172_v57, 1  ;;  %v219_v4 = vrot.slane %v174_v58, 1  ;;  %v425_v5 = vunpack.c.l.bf16 %v1113_v54  ;;  %v858_v24 = vld [vmem:[%s1083_s22 + $0x28] sm:$0xf] }
  0x1b   : > { %975 = vmatpush3.bf16.msra.mxu0 %v1073_v2  ;;  %971 = vmatmul.mubr.msk.bf16.gmra.mxu1 %vm245_vm0, %v837_v51  ;;  %v222_v7 = vrot.slane %v176_v61, 1  ;;  %v426_v8 = vunpack.c.l.bf16 %v853_v59  ;;  %v553_v9 = vrot.slane %v423_v62, 1  ;;  %v554_v10 = vrot.slane %v424_v63, 1  ;;  %v859_v25 = vld [vmem:[%s1083_s22 + $0x2c] sm:$0x1] }
  0x1c   : > { %v214_v12 = vsel %vm199_vm1, %v212_v45, %v213_v1  ;;  %v217_v13 = vsel %vm199_vm1, %v215_v46, %v216_v3  ;;  %v220_v14 = vsel %vm199_vm1, %v218_v52, %v219_v4  ;;  %v556_v15 = vrot.slane %v425_v5, 1  ;;  %v860_v26 = vld [vmem:[%s1083_s22 + $0x30] sm:$0xf]  ;;  %v861_v30 = vld [vmem:[%s1083_s22 + $0x34] sm:$0x1] }
  0x1d   : > { %v234_v2 = vpack.c.bf16 %v217_v13, %v214_v12  ;;  %v223_v17 = vsel %vm199_vm1, %v221_v60, %v222_v7  ;;  %v555_v18 = vsel %vm199_vm1, %v553_v9, %v554_v10  ;;  %v557_v19 = vrot.slane %v426_v8, 1  ;;  %v862_v31 = vld [vmem:[%s1083_s22 + $0x38] sm:$0xf]  ;;  %v863_v32 = vld [vmem:[%s1083_s22 + $0x3c] sm:$0x1] }
  0x1e   : > { %v235_v20 = vpack.c.bf16 %v223_v17, %v220_v14  ;;  %v427_v21 = vunpack.c.l.bf16 %v1119_v0  ;;  %v428_v22 = vunpack.c.l.bf16 %v855_v6  ;;  %v429_v23 = vunpack.c.l.bf16 %v1127_v11  ;;  %v864_v41 = vld [vmem:[%s1083_s22 + $0x40] sm:$0xf]  ;;  %v865_v42 = vld [vmem:[%s1083_s22 + $0x44] sm:$0x1] }
  0x1f   : > { %960 = vmatprep.mubr.msk.bf16.mxu0 %vm245_vm0, %v234_v2  ;;  %v558_v27 = vsel %vm199_vm1, %v556_v15, %v557_v19  ;;  %v430_v28 = vunpack.c.l.bf16 %v857_v16  ;;  %v866_v29 = vcombine.low %v1108_v48, %v1113_v54  ;;  %v431_v38 = vunpack.c.l.bf16 %v858_v24 }
  0x20   : > { %v585_v33 = vpack.c.bf16 %v558_v27, %v555_v18  ;;  %v559_v34 = vrot.slane %v427_v21, 1  ;;  %v560_v35 = vrot.slane %v428_v22, 1  ;;  %v562_v36 = vrot.slane %v429_v23, 1 }
  0x21   : > { %v563_v37 = vrot.slane %v430_v28, 1  ;;  %v432_v39 = vunpack.c.l.bf16 %v859_v25  ;;  %v433_v40 = vunpack.c.l.bf16 %v860_v26  ;;  %v434_v44 = vunpack.c.l.bf16 %v861_v30 }
  0x22   : > { %961 = vmatmul.mubr.msk.bf16.gmra.mxu0 %vm245_vm0, %v235_v20  ;;  %986 = vmatprep.mubr.msk.bf16.mxu1 %vm245_vm0, %v585_v33  ;;  %v561_v43 = vsel %vm199_vm1, %v559_v34, %v560_v35  ;;  %v435_v45 = vunpack.c.l.bf16 %v862_v31  ;;  %v436_v46 = vunpack.c.l.bf16 %v863_v32  ;;  %v565_v48 = vrot.slane %v431_v38, 1 }
  0x23   : > { %v564_v47 = vsel %vm199_vm1, %v562_v36, %v563_v37  ;;  %976 = vmatprep.mubr.msk.bf16.mxu0 %vm245_vm0, %v866_v29  ;;  %v566_v49 = vrot.slane %v432_v39, 1  ;;  %v568_v50 = vrot.slane %v433_v40, 1  ;;  %v569_v52 = vrot.slane %v434_v44, 1 }
  0x24   : > { %v586_v51 = vpack.c.bf16 %v564_v47, %v561_v43  ;;  %v437_v53 = vunpack.c.l.bf16 %v864_v41  ;;  %v438_v54 = vunpack.c.l.bf16 %v865_v42  ;;  %v571_v56 = vrot.slane %v435_v45, 1 }
  0x25   : > { %v567_v55 = vsel %vm199_vm1, %v565_v48, %v566_v49  ;;  %v572_v57 = vrot.slane %v436_v46, 1  ;;  %v867_v58 = vcombine.low %v1119_v0, %v1127_v11  ;;  %v570_v59 = vsel %vm199_vm1, %v568_v50, %v569_v52 }
  0x26   : > { %987 = vmatmul.mubr.msk.bf16.vlgmr.msra.gmra.mxu1 %vm245_vm0, %v586_v51  ;;  %v574_v60 = vrot.slane %v437_v53, 1  ;;  %v575_v61 = vrot.slane %v438_v54, 1  ;;  %v587_v62 = vpack.c.bf16 %v570_v59, %v567_v55  ;;  %v868_v1 = vcombine.low %v858_v24, %v860_v26 }
  0x27   : > { %v573_v63 = vsel %vm199_vm1, %v571_v56, %v572_v57  ;;  %v869_v0 = vcombine.low %v862_v31, %v864_v41 }
  0x28   : > { %v576_v3 = vsel %vm199_vm1, %v574_v60, %v575_v61  ;;  %990 = vmatprep.mubr.msk.bf16.mxu1 %vm245_vm0, %v587_v62 }
  0x29   : > { %v588_v4 = vpack.c.bf16 %v576_v3, %v573_v63 }
  0x2a   : > { %977 = vmatmul.mubr.msk.bf16.vlgmr.msra.gmra.mxu0 %vm245_vm0, %v867_v58 }
  0x2b   : > { %980 = vmatprep.mubr.msk.bf16.mxu0 %vm245_vm0, %v868_v1 }
  0x2e   : > { %991 = vmatmul.mubr.msk.bf16.gmra.mxu1 %vm245_vm0, %v588_v4 }
  0x32   : > { %981 = vmatmul.mubr.msk.bf16.gmra.mxu0 %vm245_vm0, %v869_v0 }
  0xd3   : > { %v968_v5 = vpop.f32.mrf.mxu1 }
  0xd5   : > { %v375_v6 = vpop.f32.mrf.mxu1 }
  0xd7   : > { %v969_v7 = vpop.f32.mrf.mxu1 }
  0xd9   : > { %v378_v8 = vpop.f32.mrf.mxu1 }
  0xda   : > { %v958_v9 = vpop.f32.mrf.mxu0 }
  0xdb   : > { %v972_v10 = vpop.f32.mrf.mxu1  ;;  %v384_v22 = vadd.f32 %v968_v5, %v958_v9 }
  0xdc   : > { %v292_v11 = vpop.f32.mrf.mxu0 }
  0xdd   : > { %v391_v12 = vpop.f32.mrf.mxu1  ;;  %v376_v25 = vadd.f32 %v375_v6, %v292_v11 }
  0xde   : > { %v959_v13 = vpop.f32.mrf.mxu0 }
  0xdf   : > { %v973_v14 = vpop.f32.mrf.mxu1  ;;  %v387_v29 = vadd.f32 %v969_v7, %v959_v13 }
  0xe0   : > { %v295_v15 = vpop.f32.mrf.mxu0 }
  0xe1   : > { %v394_v2 = vpop.f32.mrf.mxu1  ;;  %v379_v37 = vadd.f32 %v378_v8, %v295_v15 }
  0xe2   : > { %v962_v16 = vpop.f32.mrf.mxu0 }
  0xe3   : > { %v400_v42 = vadd.f32 %v972_v10, %v962_v16 }
  0xe4   : > { %v308_v17 = vpop.f32.mrf.mxu0 }
  0xe5   : > { %v392_v46 = vadd.f32 %v391_v12, %v308_v17 }
  0xe6   : > { %v963_v18 = vpop.f32.mrf.mxu0  ;;  %v988_v19 = vpop.f32.mrf.mxu1 }
  0xe7   : > { %v403_v52 = vadd.f32 %v973_v14, %v963_v18 }
  0xe8   : > { %v311_v20 = vpop.f32.mrf.mxu0  ;;  %v644_v21 = vpop.f32.mrf.mxu1 }
  0xe9   : > { %v395_v59 = vadd.f32 %v394_v2, %v311_v20 }
  0xea   : > { %v978_v23 = vpop.f32.mrf.mxu0  ;;  %v989_v24 = vpop.f32.mrf.mxu1 }
  0xeb   : > { %v531_v26 = vadd.f32 %v978_v23, %v384_v22 }
  0xec   : > { %v498_v27 = vpop.f32.mrf.mxu0  ;;  %v647_v28 = vpop.f32.mrf.mxu1 }
  0xed   : > { %v1166_v30 = vadd.f32 %v988_v19, %v531_v26  ;;  %v529_v31 = vadd.f32 %v498_v27, %v376_v25 }
  0xee   : > { %v979_v32 = vpop.f32.mrf.mxu0  ;;  %v992_v33 = vpop.f32.mrf.mxu1 }
  0xef   : > { %v693_v34 = vmin.f32 %v1166_v30, 0.0  ;;  %v1169_v35 = vadd.f32 %v644_v21, %v529_v31  ;;  %v532_v36 = vadd.f32 %v979_v32, %v387_v29  ;;  %vm685_vm2 = vcmp.gt.f32.partialorder %v1166_v30, 0.0 }
  0xf0   : > { %v501_v38 = vpop.f32.mrf.mxu0  ;;  %v660_v44 = vpop.f32.mrf.mxu1 }
  0xf1   : > { %v703_v39 = vmul.f32 1.442695, %v693_v34  ;;  %v691_v40 = vmin.f32 %v1169_v35, 0.0  ;;  %v678_v41 = vadd.f32 %v989_v24, %v532_v36  ;;  %v530_v43 = vadd.f32 %v501_v38, %v379_v37 }
  0xf2   : > { %v982_v45 = vpop.f32.mrf.mxu0  ;;  %v993_v57 = vpop.f32.mrf.mxu1  ;;  %vm683_vm4 = vcmp.gt.f32.partialorder %v1169_v35, 0.0 }
  0xf3   : > { %1015 = vpow2.f32 %v703_v39  ;;  %v699_v47 = vmul.f32 1.442695, %v691_v40  ;;  %v694_v48 = vmin.f32 %v678_v41, 0.0  ;;  %v676_v49 = vadd.f32 %v647_v28, %v530_v43 }
  0xf4   : > { %v535_v50 = vadd.f32 %v982_v45, %v400_v42  ;;  %v514_v51 = vpop.f32.mrf.mxu0  ;;  %v663_v6 = vpop.f32.mrf.mxu1  ;;  %vm686_vm3 = vcmp.gt.f32.partialorder %v678_v41, 0.0 }
  0xf5   : > { %v705_v53 = vmul.f32 1.442695, %v694_v48  ;;  %v533_v54 = vadd.f32 %v514_v51, %v392_v46  ;;  %1017 = vpow2.f32 %v699_v47  ;;  %v692_v55 = vmin.f32 %v676_v49, 0.0 }
  0xf6   : > { %v681_v56 = vadd.f32 %v992_v33, %v535_v50  ;;  %v983_v58 = vpop.f32.mrf.mxu0  ;;  %vm684_vm5 = vcmp.gt.f32.partialorder %v676_v49, 0.0 }
  0xf7   : > { %1019 = vpow2.f32 %v705_v53  ;;  %v679_v60 = vadd.f32 %v660_v44, %v533_v54  ;;  %v536_v61 = vadd.f32 %v983_v58, %v403_v52  ;;  %v701_v62 = vmul.f32 1.442695, %v692_v55 }
  0xf8   : > { %v697_v63 = vmin.f32 %v681_v56, 0.0  ;;  %v517_v1 = vpop.f32.mrf.mxu0  ;;  %vm689_vm6 = vcmp.gt.f32.partialorder %v681_v56, 0.0 }
  0xf9   : > { %v695_v3 = vmin.f32 %v679_v60, 0.0  ;;  %v682_v4 = vadd.f32 %v993_v57, %v536_v61  ;;  %v534_v0 = vadd.f32 %v517_v1, %v395_v59  ;;  %1021 = vpow2.f32 %v701_v62 }
  0xfa   : > { %v711_v5 = vmul.f32 1.442695, %v697_v63  ;;  %vm687_vm8 = vcmp.gt.f32.partialorder %v679_v60, 0.0 }
  0xfb   : > { %v707_v7 = vmul.f32 1.442695, %v695_v3  ;;  %v698_v8 = vmin.f32 %v682_v4, 0.0  ;;  %v680_v9 = vadd.f32 %v663_v6, %v534_v0  ;;  %vm690_vm7 = vcmp.gt.f32.partialorder %v682_v4, 0.0 }
  0xfc   : > { %1023 = vpow2.f32 %v711_v5 }
  0xfd   : > { %1025 = vpow2.f32 %v707_v7  ;;  %v713_v10 = vmul.f32 1.442695, %v698_v8  ;;  %v696_v11 = vmin.f32 %v680_v9, 0.0  ;;  %vm688_vm9 = vcmp.gt.f32.partialorder %v680_v9, 0.0 }
  0xff   : > { %1027 = vpow2.f32 %v713_v10  ;;  %v709_v12 = vmul.f32 1.442695, %v696_v11 }
 0x100   : > { %v1016_v13 = vpop.eup %1015 }
 0x101   : > { %1029 = vpow2.f32 %v709_v12  ;;  %v886_v15 = vadd.f32 -1.0, %v1016_v13 }
 0x102   : > { %v1018_v14 = vpop.eup %1017 }
 0x103   : > { %v884_v17 = vadd.f32 -1.0, %v1018_v14  ;;  %v725_v19 = vsel %vm685_vm2, %v1166_v30, %v886_v15 }
 0x104   : > { %v1020_v16 = vpop.eup %1019 }
 0x105   : > { %v887_v2 = vadd.f32 -1.0, %v1020_v16  ;;  %v723_v25 = vsel %vm683_vm4, %v1169_v35, %v884_v17 }
 0x106   : > { %v1022_v18 = vpop.eup %1021 }
 0x107   : > { %v726_v20 = vsel %vm686_vm3, %v678_v41, %v887_v2  ;;  %v885_v22 = vadd.f32 -1.0, %v1022_v18 }
 0x108   : > { %v919_v21 = vpack.c.bf16 %v726_v20, %v725_v19 }
 0x109   : > { %v1024_v23 = vpop.eup %1023  ;;  %v724_v26 = vsel %vm684_vm5, %v676_v49, %v885_v22 }
 0x10a   : > { %v1026_v24 = vpop.eup %1025  ;;  %931 = vst [vmem:[%s143_s26 + $0x8] sm:$0xff] %v919_v21   ;;  %v914_v27 = vpack.c.bf16 %v724_v26, %v723_v25  ;;  %v890_v28 = vadd.f32 -1.0, %v1024_v23 }
 0x10b   : > { %v888_v30 = vadd.f32 -1.0, %v1026_v24 }
 0x10c   : > { %v1028_v29 = vpop.eup %1027  ;;  %915 = vst [vmem:[%s143_s26] sm:$0xff] %v914_v27   ;;  %v729_v33 = vsel %vm689_vm6, %v681_v56, %v890_v28 }
 0x10d   : > { %v891_v31 = vadd.f32 -1.0, %v1028_v29  ;;  %v727_v38 = vsel %vm687_vm8, %v679_v60, %v888_v30 }
 0x10e   : > { %v1030_v32 = vpop.eup %1029 }
 0x10f   : > { %v730_v34 = vsel %vm690_vm7, %v682_v4, %v891_v31  ;;  %v889_v36 = vadd.f32 -1.0, %v1030_v32 }
 0x110   : > { %v929_v37 = vpack.c.bf16 %v730_v34, %v729_v33 }
 0x111   : > { %v728_v39 = vsel %vm688_vm9, %v680_v9, %v889_v36 }
 0x112   : > { %933 = vst [vmem:[%s143_s26 + $0x18] sm:$0xff] %v929_v37   ;;  %v924_v35 = vpack.c.bf16 %v728_v39, %v727_v38 }
 0x114   : > { %932 = vst [vmem:[%s143_s26 + $0x10] sm:$0xff] %v924_v35  }
 0x115 PF: > { %s12_s9 = sadd.s32 1, %s1037_s9  }
 0x116   : > { %p9_p4 = scmp.ge.s32.totalorder %s12_s9, 4  }
 0x118   :  { %11 = sbr.rel (!%p9_p4) target bundleno = 1 (0x1), region = 62 }

// kernel: unet_innermost_forward.5
= control target key start
LH: loop header
LB: loop body
LE: loop exit
PB: predicated region body
PF: predicated region fallthrough
CT: control target
= control target key end

     0   :  { %s421_s12 = smov 0   ;;  %s447_s0 = inlined_call_operand.vmem [shape: bf16[2,64,128], index: 0, kind: input, shape index: {}, may-alias: {0,3}]   ;;  %s448_s1 = inlined_call_operand.vmem [shape: f32[1,128], index: 1, kind: input, shape index: {}]   ;;  %s449_s2 = inlined_call_operand.vmem [shape: f32[1,128], index: 2, kind: input, shape index: {}]   ;;  %s450_s3 = inlined_call_operand.vmem [shape: bf16[2,64,128], index: 3, kind: output, shape index: {}, may-alias: {0,3}]  }
   0x1 LB: > { %s312_s13 = sadd.s32 4294967295, %s399_s12   ;;  %p316_p0 = scmp.ge.s32.totalorder %s399_s12, 1  ;;  %s399_s12 = sphi %s421_s12, %s13_s12  }
   0x2   : > { %p137_p1 = scmp.lt.s32.totalorder %s399_s12, 3 }
   0x4   : > { %p138_p2 = pnand %p316_p0, %p137_p1 }
   0x5   : > { %p161_p3 = scmp.lt.s32.totalorder (!%p138_p2), %s312_s13, 1 }
   0x6   : > { %141 = sbr.rel (%p138_p2) target bundleno = 25 (0x19), region = 32 }
   0xb   : > { %s452_s13 = smov (!%p161_p3, %s312_s13), 1  ;;  %v321_v0 = vld [vmem:[%s448_s1] ss:$0 sm:$0xff] }
   0xc   : > { %s333_s14 = sshll.u32 %s452_s13, 5  ;;  %v322_v13 = vld [vmem:[%s449_s2] ss:$0 sm:$0xff] }
   0xd   : > { %s165_s17 = scalar_lea.vmem %s447_s0, %s333_s14  ;;  %s170_s24 = scalar_lea.vmem %s450_s3, %s333_s14 }
   0xe   : > { %v344_v1 = vld [vmem:[%s165_s17] sm:$0xff]   ;;  %v379_v2 = vld [vmem:[%s165_s17 + $0x8] sm:$0xff]   ;;  %v380_v3 = vld [vmem:[%s165_s17 + $0x10] sm:$0xff]  }
   0xf   : > { %v345_v4 = vunpack.c.l.bf16 %v344_v1  ;;  %v346_v5 = vunpack.c.h.bf16 %v344_v1  ;;  %v349_v6 = vunpack.c.l.bf16 %v379_v2  ;;  %v350_v7 = vunpack.c.h.bf16 %v379_v2  ;;  %v381_v8 = vld [vmem:[%s165_s17 + $0x18] sm:$0xff]  }
  0x10   : > { %v353_v9 = vunpack.c.l.bf16 %v380_v3  ;;  %v354_v10 = vunpack.c.h.bf16 %v380_v3  ;;  %v357_v11 = vunpack.c.l.bf16 %v381_v8  ;;  %v358_v12 = vunpack.c.h.bf16 %v381_v8 }
  0x11   : > { %v194_v14 = vmul.f32 %v345_v4, %v321_v0  ;;  %v195_v15 = vmul.f32 %v346_v5, %v321_v0  ;;  %v196_v16 = vmul.f32 %v349_v6, %v321_v0  ;;  %v197_v17 = vmul.f32 %v350_v7, %v321_v0 }
  0x12   : > { %v198_v18 = vmul.f32 %v353_v9, %v321_v0  ;;  %v199_v19 = vmul.f32 %v354_v10, %v321_v0  ;;  %v200_v20 = vmul.f32 %v357_v11, %v321_v0  ;;  %v201_v21 = vmul.f32 %v358_v12, %v321_v0 }
  0x13   : > { %v209_v22 = vadd.f32 %v322_v13, %v194_v14  ;;  %v210_v23 = vadd.f32 %v322_v13, %v195_v15  ;;  %v211_v24 = vadd.f32 %v322_v13, %v196_v16  ;;  %v212_v25 = vadd.f32 %v322_v13, %v197_v17 }
  0x14   : > { %v213_v26 = vadd.f32 %v322_v13, %v198_v18  ;;  %v214_v27 = vadd.f32 %v322_v13, %v199_v19  ;;  %v215_v28 = vadd.f32 %v322_v13, %v200_v20  ;;  %v216_v29 = vadd.f32 %v322_v13, %v201_v21 }
  0x15   : > { %v362_v30 = vpack.c.bf16 %v210_v23, %v209_v22  ;;  %v367_v31 = vpack.c.bf16 %v212_v25, %v211_v24 }
  0x16   : > { %v372_v32 = vpack.c.bf16 %v214_v27, %v213_v26  ;;  %v377_v33 = vpack.c.bf16 %v216_v29, %v215_v28 }
  0x17   : > { %363 = vst [vmem:[%s170_s24] sm:$0xff] %v362_v30   ;;  %382 = vst [vmem:[%s170_s24 + $0x8] sm:$0xff] %v367_v31  }
  0x18   : > { %383 = vst [vmem:[%s170_s24 + $0x10] sm:$0xff] %v372_v32   ;;  %384 = vst [vmem:[%s170_s24 + $0x18] sm:$0xff] %v377_v33  }
  0x19 PF: > { %s13_s12 = sadd.s32 1, %s399_s12  }
  0x1a   : > { %p10_p4 = scmp.ge.s32.totalorder %s13_s12, 4  }
  0x1c   :  { %12 = sbr.rel (!%p10_p4) target bundleno = 1 (0x1), region = 62 }

// kernel: unet_innermost_forward.4
= control target key start
LH: loop header
LB: loop body
LE: loop exit
PB: predicated region body
PF: predicated region fallthrough
CT: control target
= control target key end

     0   :  { %s2846_s15 = smov 0   ;;  %s2848_s16 = smov 0   ;;  %s3456_s0 = inlined_call_operand.vmem [shape: bf16[2,10,10,128], index: 0, kind: input, shape index: {}]   ;;  %s3457_s1 = inlined_call_operand.vmem [shape: bf16[9,128,128], index: 1, kind: input, shape index: {}]   ;;  %s3458_s2 = inlined_call_operand.vmem [shape: bf16[2,64,128], index: 2, kind: output, shape index: {0}]   ;;  %s3459_s3 = inlined_call_operand.vmem [shape: f32[2,1,128], index: 3, kind: output, shape index: {1}]   ;;  %s3460_s4 = inlined_call_operand.vmem [shape: f32[2,1,128], index: 4, kind: output, shape index: {2}]  }
   0x1   :  { %s2850_s17 = smov 0  }
   0x2 LB: > { %s27_s18 = sadd.s32 1, %s2814_s16  ;;  %p2056_p0 = scmp.ge.s32.totalorder %s2818_s17, 1  ;;  %s2818_s17 = sphi %s2850_s17, %s15_s17   ;;  %s2814_s16 = sphi %s2848_s16, %s3472_s16   ;;  %s2810_s15 = sphi %s2846_s15, %s3471_s15  }
   0x3   : > { %p29_p1 = scmp.ge.s32.totalorder %s27_s18, 2  ;;  %p185_p2 = scmp.lt.s32.totalorder %s2818_s17, 3 }
   0x5   : > { %s3474_s18 = smov (%p29_p1, %s27_s18), 0  ;;  %p186_p3 = pnand %p2056_p0, %p185_p2 }
   0x7   : > { %189 = sbr.rel (%p186_p3) target bundleno = 409 (0x199), region = 28 }
   0xc   : > { %v2712_v0 = vld [vmem:[%s3457_s1 + $0x78] sm:$0xff]   ;;  %p220_p4 = scmp.lt.s32.totalorder %s2810_s15, 1  ;;  %v2714_v2 = vld [vmem:[%s3457_s1 + $0x70] sm:$0xff]   ;;  %v2716_v4 = vld [vmem:[%s3457_s1 + $0x68] sm:$0xff]   ;;  %vm314_vm0 = vcmask 1046528   ;;  %vm594_vm1 = vcmask 1045504  }
   0xd   : > { %v2713_v1 = vld [vmem:[%s3457_s1 + $0x38] sm:$0xff]   ;;  %2454 = vmatprep.subr.bf16.mxu0 %v2712_v0  ;;  %v2715_v3 = vld [vmem:[%s3457_s1 + $0x30] sm:$0xff]   ;;  %v2717_v5 = vld [vmem:[%s3457_s1 + $0x28] sm:$0xff]  }
   0xe   : > { %2478 = vmatprep.subr.bf16.mxu1 %v2713_v1  ;;  %2455 = vmatpush3.bf16.msra.mxu0 %v2712_v0  ;;  %s3476_s15 = smov (!%p220_p4, %s2810_s15), 1  ;;  %v2718_v6 = vld [vmem:[%s3457_s1 + $0x60] sm:$0xff]   ;;  %v2720_v8 = vld [vmem:[%s3457_s1 + $0x58] sm:$0xff]   ;;  %v2722_v10 = vld [vmem:[%s3457_s1 + $0x50] sm:$0xff]  }
   0xf   : > { %2479 = vmatpush3.bf16.msra.mxu1 %v2713_v1  ;;  %2456 = vmatprep.subr.bf16.mxu0 %v2714_v2  ;;  %v2719_v7 = vld [vmem:[%s3457_s1 + $0x20] sm:$0xff]   ;;  %s2686_s9 = smul.u32 80, %s3476_s15  ;;  %v2721_v9 = vld [vmem:[%s3457_s1 + $0x18] sm:$0xff]   ;;  %v2723_v11 = vld [vmem:[%s3457_s1 + $0x10] sm:$0xff]   ;;  %s3412_s19 = scalar_lea.vmem %s3459_s3, %s3476_s15 }
  0x10   : > { %2480 = vmatprep.subr.bf16.mxu1 %v2715_v3  ;;  %v2724_v31 = vld [vmem:[%s3457_s1 + $0x48] sm:$0xff]   ;;  %v2726_v42 = vld [vmem:[%s3457_s1 + $0x40] sm:$0xff]   ;;  %v2730_v44 = vld [vmem:[%s3457_s1 + $0xb8] sm:$0xff]   ;;  %s3418_s23 = scalar_lea.vmem %s3460_s4, %s3476_s15  ;;  %s2314_s24 = sshll.u32 %s3476_s15, 5 }
  0x11   : > { %s2900_s20 = scalar_lea.vmem %s3456_s0, %s2686_s9  ;;  %v2725_v34 = vld [vmem:[%s3457_s1 + $0x8] sm:$0xff]   ;;  %v2727_v43 = vld [vmem:[%s3457_s1] sm:$0xff]   ;;  %v2731_v47 = vld [vmem:[%s3457_s1 + $0xf8] sm:$0xff]   ;;  %s231_s26 = scalar_lea.vmem %s3458_s2, %s2314_s24 }
  0x12   : > { %2457 = vmatpush3.bf16.msra.mxu0 %v2714_v2  ;;  %v246_v12 = vld [vmem:[%s2900_s20] sm:$0xf]  ;;  %v247_v13 = vld [vmem:[%s2900_s20 + $0x4] sm:$0x1]  ;;  %v248_v14 = vld [vmem:[%s2900_s20 + $0x8] sm:$0xf] }
  0x13   : > { %2481 = vmatpush3.bf16.msra.mxu1 %v2715_v3  ;;  %2458 = vmatprep.subr.bf16.mxu0 %v2716_v4  ;;  %v249_v15 = vld [vmem:[%s2900_s20 + $0xc] sm:$0x1]  ;;  %v262_v16 = vunpack.c.l.bf16 %v246_v12  ;;  %v263_v17 = vunpack.c.l.bf16 %v247_v13  ;;  %v264_v18 = vunpack.c.l.bf16 %v248_v14  ;;  %v2060_v19 = vcombine.low %v246_v12, %v248_v14  ;;  %v2913_v20 = vld [vmem:[%s2900_s20 + $0x10] sm:$0xf]  ;;  %v2916_v21 = vld [vmem:[%s2900_s20 + $0x14] sm:$0x1] }
  0x14   : > { %2482 = vmatprep.subr.bf16.mxu1 %v2717_v5  ;;  %v265_v22 = vunpack.c.l.bf16 %v249_v15  ;;  %v2919_v23 = vld [vmem:[%s2900_s20 + $0x18] sm:$0xf]  ;;  %v2922_v24 = vld [vmem:[%s2900_s20 + $0x1c] sm:$0x1]  ;;  %v266_v25 = vunpack.c.l.bf16 %v2913_v20  ;;  %v267_v26 = vunpack.c.l.bf16 %v2916_v21  ;;  %v2732_v53 = vld [vmem:[%s3457_s1 + $0xb0] sm:$0xff]  }
  0x15   : > { %v315_v27 = vrot.slane %v262_v16, 1  ;;  %v316_v28 = vrot.slane %v263_v17, 1  ;;  %v318_v29 = vrot.slane %v264_v18, 1  ;;  %2494 = vmatprep.mubr.bf16.mxu1 %v2060_v19  ;;  %v268_v30 = vunpack.c.l.bf16 %v2919_v23  ;;  %v2962_v54 = vld [vmem:[%s2900_s20 + $0x20] sm:$0xf]  ;;  %v2734_v15 = vld [vmem:[%s3457_s1 + $0xa8] sm:$0xff]  }
  0x16   : > { %2459 = vmatpush3.bf16.msra.mxu0 %v2716_v4  ;;  %v319_v32 = vrot.slane %v265_v22, 1  ;;  %v269_v33 = vunpack.c.l.bf16 %v2922_v24  ;;  %v321_v37 = vrot.slane %v266_v25, 1  ;;  %v322_v38 = vrot.slane %v267_v26, 1  ;;  %v2965_v55 = vld [vmem:[%s2900_s20 + $0x24] sm:$0x1] }
  0x17   : > { %2483 = vmatpush3.bf16.msra.mxu1 %v2717_v5  ;;  %2460 = vmatprep.subr.bf16.mxu0 %v2718_v6  ;;  %v317_v35 = vsel %vm314_vm0, %v315_v27, %v316_v28  ;;  %v324_v40 = vrot.slane %v268_v30, 1  ;;  %v595_v48 = vrot.slane %v262_v16, 2  ;;  %v596_v49 = vrot.slane %v263_v17, 2  ;;  %v2968_v56 = vld [vmem:[%s2900_s20 + $0x28] sm:$0xf]  ;;  %v2746_v21 = vld [vmem:[%s3457_s1 + $0x80] sm:$0xff]  }
  0x18   : > { %2484 = vmatprep.subr.bf16.mxu1 %v2719_v7  ;;  %v320_v36 = vsel %vm314_vm0, %v318_v29, %v319_v32  ;;  %v325_v41 = vrot.slane %v269_v33, 1  ;;  %v323_v45 = vsel %vm314_vm0, %v321_v37, %v322_v38  ;;  %v598_v50 = vrot.slane %v264_v18, 2  ;;  %v2973_v58 = vld [vmem:[%s2900_s20 + $0x2c] sm:$0x1]  ;;  %v2979_v62 = vld [vmem:[%s2900_s20 + $0x30] sm:$0xf] }
  0x19   : > { %v347_v39 = vpack.c.bf16 %v320_v36, %v317_v35  ;;  %v599_v51 = vrot.slane %v265_v22, 2  ;;  %v2061_v57 = vcombine.low %v2913_v20, %v2919_v23  ;;  %v270_v59 = vunpack.c.l.bf16 %v2962_v54  ;;  %v2982_v63 = vld [vmem:[%s2900_s20 + $0x34] sm:$0x1]  ;;  %v2988_v2 = vld [vmem:[%s2900_s20 + $0x38] sm:$0xf]  ;;  %v2735_v18 = vld [vmem:[%s3457_s1 + $0xe8] sm:$0xff]  }
  0x1a   : > { %2461 = vmatpush3.bf16.msra.mxu0 %v2718_v6  ;;  %v326_v46 = vsel %vm314_vm0, %v324_v40, %v325_v41  ;;  %v271_v60 = vunpack.c.l.bf16 %v2965_v55  ;;  %v272_v61 = vunpack.c.l.bf16 %v2968_v56  ;;  %v273_v0 = vunpack.c.l.bf16 %v2973_v58  ;;  %v2991_v3 = vld [vmem:[%s2900_s20 + $0x3c] sm:$0x1]  ;;  %v2733_v6 = vld [vmem:[%s3457_s1 + $0xf0] sm:$0xff]   ;;  %v3031_v36 = vld [vmem:[%s2900_s20 + $0x8] sm:$0xf] }
  0x1b   : > { %2485 = vmatpush3.bf16.msra.mxu1 %v2719_v7  ;;  %2462 = vmatprep.subr.bf16.mxu0 %v2720_v8  ;;  %v348_v52 = vpack.c.bf16 %v326_v46, %v323_v45  ;;  %v2062_v1 = vcombine.low %v2962_v54, %v2968_v56  ;;  %v274_v4 = vunpack.c.l.bf16 %v2979_v62  ;;  %v275_v5 = vunpack.c.l.bf16 %v2982_v63  ;;  %v3034_v37 = vld [vmem:[%s2900_s20 + $0x10] sm:$0xf]  ;;  %v2736_v38 = vld [vmem:[%s3457_s1 + $0xa0] sm:$0xff]   ;;  %v2745_v20 = vld [vmem:[%s3457_s1 + $0xc8] sm:$0xff]  }
  0x1c   : > { %2486 = vmatprep.subr.bf16.mxu1 %v2721_v9  ;;  %2470 = vmatprep.mubr.bf16.mxu0 %v347_v39  ;;  %v327_v7 = vrot.slane %v270_v59, 1  ;;  %v277_v12 = vunpack.c.l.bf16 %v2991_v3  ;;  %v600_v32 = vsel %vm594_vm1, %v598_v50, %v599_v51  ;;  %v2063_v35 = vcombine.low %v2979_v62, %v2988_v2  ;;  %v2737_v39 = vld [vmem:[%s3457_s1 + $0xe0] sm:$0xff]   ;;  %v2743_v45 = vld [vmem:[%s3457_s1 + $0xd0] sm:$0xff]   ;;  %v2744_v50 = vld [vmem:[%s3457_s1 + $0x88] sm:$0xff]  }
  0x1d   : > { %v333_v13 = vrot.slane %v274_v4, 1  ;;  %v334_v14 = vrot.slane %v275_v5, 1  ;;  %v2136_v41 = vcombine.low %v3031_v36, %v3034_v37  ;;  %v601_v46 = vrot.slane %v266_v25, 2  ;;  %v2747_v24 = vld [vmem:[%s3457_s1 + $0xc0] sm:$0xff]   ;;  %v2121_v58 = vld [vmem:[%s2900_s20 + $0xc] sm:$0x1] }
  0x1e   : > { %2463 = vmatpush3.bf16.msra.mxu0 %v2720_v8  ;;  %v328_v8 = vrot.slane %v271_v60, 1  ;;  %v337_v27 = vrot.slane %v277_v12, 1  ;;  %v607_v23 = vrot.slane %v270_v59, 2  ;;  %v608_v25 = vrot.slane %v271_v60, 2  ;;  %v3095_v56 = vld [vmem:[%s2900_s20 + $0x20] sm:$0xf] }
  0x1f   : > { %2487 = vmatpush3.bf16.msra.mxu1 %v2721_v9  ;;  %2464 = vmatprep.subr.bf16.mxu0 %v2722_v10  ;;  %v330_v9 = vrot.slane %v272_v61, 1  ;;  %v335_v22 = vsel %vm314_vm0, %v333_v13, %v334_v14  ;;  %v611_v51 = vrot.slane %v273_v0, 2  ;;  %v786_v55 = vunpack.c.l.bf16 %v3031_v36  ;;  %v2123_v59 = vld [vmem:[%s2900_s20 + $0x14] sm:$0x1]  ;;  %v2750_v60 = vld [vmem:[%s3457_s1 + $0x178] sm:$0xff]  }
  0x20   : > { %2488 = vmatprep.subr.bf16.mxu1 %v2723_v11  ;;  %v329_v16 = vsel %vm314_vm0, %v327_v7, %v328_v8  ;;  %v617_v8 = vrot.slane %v277_v12, 2  ;;  %v3115_v14 = vld [vmem:[%s2900_s20 + $0x28] sm:$0xf]  ;;  %v2753_v3 = vld [vmem:[%s3457_s1 + $0x170] sm:$0xff]  }
  0x21   : > { %v960_v62 = vrot.slane %v786_v55, 1 }
  0x22   : > { %2465 = vmatpush3.bf16.msra.mxu0 %v2722_v10  ;;  %v276_v10 = vunpack.c.l.bf16 %v2988_v2  ;;  %v2752_v2 = vld [vmem:[%s3457_s1 + $0x130] sm:$0xff]  }
  0x23   : > { %2489 = vmatpush3.bf16.msra.mxu1 %v2723_v11  ;;  %2466 = vmatprep.subr.bf16.mxu0 %v2724_v31  ;;  %v331_v11 = vrot.slane %v273_v0, 1 }
  0x24   : > { %2490 = vmatprep.subr.bf16.mxu1 %v2725_v34  ;;  %v336_v17 = vrot.slane %v276_v10, 1  ;;  %v616_v7 = vrot.slane %v276_v10, 2 }
  0x25   : > { %v332_v19 = vsel %vm314_vm0, %v330_v9, %v331_v11  ;;  %v787_v9 = vunpack.c.l.bf16 %v2121_v58  ;;  %v789_v11 = vunpack.c.l.bf16 %v2123_v59  ;;  %v2765_v59 = vld [vmem:[%s3457_s1 + $0x148] sm:$0xff]  }
  0x26   : > { %2467 = vmatpush3.bf16.msra.mxu0 %v2724_v31  ;;  %v349_v28 = vpack.c.bf16 %v332_v19, %v329_v16  ;;  %v338_v29 = vsel %vm314_vm0, %v336_v17, %v337_v27  ;;  %v597_v31 = vsel %vm594_vm1, %v595_v48, %v596_v49  ;;  %v604_v48 = vrot.slane %v268_v30, 2  ;;  %v3134_v27 = vld [vmem:[%s2900_s20 + $0x38] sm:$0xf] }
  0x27   : > { %2491 = vmatpush3.bf16.msra.mxu1 %v2725_v34  ;;  %2468 = vmatprep.subr.bf16.mxu0 %v2726_v42  ;;  %v350_v34 = vpack.c.bf16 %v338_v29, %v335_v22  ;;  %v627_v40 = vpack.c.bf16 %v600_v32, %v597_v31  ;;  %v605_v49 = vrot.slane %v269_v33, 2  ;;  %v610_v33 = vrot.slane %v272_v61, 2  ;;  %v2754_v22 = vld [vmem:[%s3457_s1 + $0x128] sm:$0xff]   ;;  %v3137_v31 = vld [vmem:[%s2900_s20 + $0x40] sm:$0xf] }
  0x28   : > { %2492 = vmatprep.subr.bf16.mxu1 %v2727_v43  ;;  %v609_v61 = vsel %vm594_vm1, %v607_v23, %v608_v25  ;;  %v961_v16 = vrot.slane %v787_v9, 1  ;;  %v964_v17 = vrot.slane %v789_v11, 1  ;;  %v618_v19 = vsel %vm594_vm1, %v616_v7, %v617_v8  ;;  %v2755_v32 = vld [vmem:[%s3457_s1 + $0x168] sm:$0xff]   ;;  %v2763_v23 = vld [vmem:[%s3457_s1 + $0x150] sm:$0xff]   ;;  %v2135_v7 = vld [vmem:[%s2900_s20 + $0x44] sm:$0x1] }
  0x29   : > { %v606_v30 = vsel %vm594_vm1, %v604_v48, %v605_v49  ;;  %v612_v0 = vsel %vm594_vm1, %v610_v33, %v611_v51  ;;  %v1138_v29 = vrot.slane %v789_v11, 2  ;;  %v792_v49 = vunpack.c.l.bf16 %v3095_v56 }
  0x2a   : > { %2469 = vmatpush3.bf16.msra.mxu0 %v2726_v42  ;;  %v2738_v42 = vld [vmem:[%s3457_s1 + $0x98] sm:$0xff]   ;;  %v794_v33 = vunpack.c.l.bf16 %v3115_v14 }
  0x2b   : > { %2493 = vmatpush3.bf16.msra.mxu1 %v2727_v43  ;;  %2502 = vmatprep.subr.bf16.mxu0 %v2730_v44  ;;  %v2739_v43 = vld [vmem:[%s3457_s1 + $0xd8] sm:$0xff]   ;;  %v969_v25 = vrot.slane %v792_v49, 1  ;;  %v1143_v58 = vrot.slane %v792_v49, 2 }
  0x2c   : > { %2526 = vmatprep.subr.bf16.mxu1 %v2731_v47  ;;  %v972_v8 = vrot.slane %v794_v33, 1  ;;  %v1146_v11 = vrot.slane %v794_v33, 2 }
  0x2d   : > { %2471 = vmatmul.mubr.bf16.vlgmr.msra.gmra.mxu0 %v348_v52  ;;  %v2749_v52 = vld [vmem:[%s3457_s1 + $0x138] sm:$0xff]  }
  0x2e   : > { %2495 = vmatmul.mubr.bf16.vlgmr.msra.gmra.mxu1 %v2061_v57  ;;  %2503 = vmatpush3.bf16.msra.mxu0 %v2730_v44  ;;  %v2742_v44 = vld [vmem:[%s3457_s1 + $0x90] sm:$0xff]   ;;  %v788_v57 = vunpack.c.l.bf16 %v3034_v37  ;;  %v2139_v37 = vcombine.low %v3134_v27, %v3137_v31 }
  0x2f   : > { %2527 = vmatpush3.bf16.msra.mxu1 %v2731_v47  ;;  %2504 = vmatprep.subr.bf16.mxu0 %v2732_v53  ;;  %v602_v47 = vrot.slane %v267_v26, 2 }
  0x30   : > { %2528 = vmatprep.subr.bf16.mxu1 %v2733_v6  ;;  %2498 = vmatprep.mubr.bf16.mxu1 %v2062_v1  ;;  %v613_v1 = vrot.slane %v274_v4, 2  ;;  %v963_v63 = vrot.slane %v788_v57, 1  ;;  %v1134_v4 = vrot.slane %v786_v55, 2  ;;  %v1137_v10 = vrot.slane %v788_v57, 2  ;;  %v2764_v55 = vld [vmem:[%s3457_s1 + $0x108] sm:$0xff]  }
  0x31   : > { %2474 = vmatprep.mubr.bf16.mxu0 %v349_v28  ;;  %v603_v26 = vsel %vm594_vm1, %v601_v46, %v602_v47  ;;  %v1135_v28 = vrot.slane %v787_v9, 2  ;;  %v2125_v46 = vld [vmem:[%s2900_s20 + $0x1c] sm:$0x1]  ;;  %v2127_v47 = vld [vmem:[%s2900_s20 + $0x24] sm:$0x1] }
  0x32   : > { %2505 = vmatpush3.bf16.msra.mxu0 %v2732_v53  ;;  %v3090_v53 = vld [vmem:[%s2900_s20 + $0x18] sm:$0xf]  ;;  %v628_v54 = vpack.c.bf16 %v606_v30, %v603_v26  ;;  %v965_v36 = vsel %vm314_vm0, %v963_v63, %v964_v17  ;;  %v2129_v30 = vld [vmem:[%s2900_s20 + $0x2c] sm:$0x1] }
  0x33   : > { %2529 = vmatpush3.bf16.msra.mxu1 %v2733_v6  ;;  %2506 = vmatprep.subr.bf16.mxu0 %v2734_v15  ;;  %v614_v6 = vrot.slane %v275_v5, 2  ;;  %v2137_v13 = vcombine.low %v3090_v53, %v3095_v56  ;;  %v629_v5 = vpack.c.bf16 %v612_v0, %v609_v61  ;;  %v790_v48 = vunpack.c.l.bf16 %v3090_v53  ;;  %v2133_v0 = vld [vmem:[%s2900_s20 + $0x3c] sm:$0x1] }
  0x34   : > { %2530 = vmatprep.subr.bf16.mxu1 %v2735_v18  ;;  %v798_v53 = vunpack.c.l.bf16 %v3134_v27 }
  0x35   : > { %2475 = vmatmul.mubr.bf16.gmra.mxu0 %v350_v34  ;;  %v1140_v26 = vrot.slane %v790_v48, 2 }
  0x36   : > { %2507 = vmatpush3.bf16.msra.mxu0 %v2734_v15  ;;  %2499 = vmatmul.mubr.bf16.gmra.mxu1 %v2063_v35  ;;  %v3118_v15 = vld [vmem:[%s2900_s20 + $0x30] sm:$0xf]  ;;  %v962_v35 = vsel %vm314_vm0, %v960_v62, %v961_v16  ;;  %v2766_v62 = vld [vmem:[%s3457_s1 + $0x100] sm:$0xff]   ;;  %v2768_v16 = vld [vmem:[%s3457_s1 + $0x1b8] sm:$0xff]   ;;  %v1152_v27 = vrot.slane %v798_v53, 2 }
  0x37   : > { %2531 = vmatpush3.bf16.msra.mxu1 %v2735_v18  ;;  %2508 = vmatprep.subr.bf16.mxu0 %v2736_v38  ;;  %v2138_v12 = vcombine.low %v3115_v14, %v3118_v15  ;;  %v615_v18 = vsel %vm594_vm1, %v613_v1, %v614_v6  ;;  %v796_v51 = vunpack.c.l.bf16 %v3118_v15  ;;  %v795_v1 = vunpack.c.l.bf16 %v2129_v30 }
  0x38   : > { %2532 = vmatprep.subr.bf16.mxu1 %v2737_v39  ;;  %2518 = vmatprep.mubr.bf16.mxu0 %v627_v40  ;;  %v630_v34 = vpack.c.bf16 %v618_v19, %v615_v18  ;;  %v2758_v40 = vld [vmem:[%s3457_s1 + $0x120] sm:$0xff]   ;;  %v978_v14 = vrot.slane %v798_v53, 1 }
  0x39   : > { %2542 = vmatprep.mubr.bf16.mxu1 %v2136_v41  ;;  %v2759_v41 = vld [vmem:[%s3457_s1 + $0x160] sm:$0xff]   ;;  %v975_v9 = vrot.slane %v796_v51, 1  ;;  %v973_v17 = vrot.slane %v795_v1, 1  ;;  %v1147_v19 = vrot.slane %v795_v1, 2 }
  0x3a   : > { %2509 = vmatpush3.bf16.msra.mxu0 %v2736_v38  ;;  %v1136_v38 = vsel %vm594_vm1, %v1134_v4, %v1135_v28  ;;  %v2769_v28 = vld [vmem:[%s3457_s1 + $0x1f8] sm:$0xff]  }
  0x3b   : > { %2533 = vmatpush3.bf16.msra.mxu1 %v2737_v39  ;;  %2510 = vmatprep.subr.bf16.mxu0 %v2738_v42  ;;  %v1139_v39 = vsel %vm594_vm1, %v1137_v10, %v1138_v29  ;;  %v799_v10 = vunpack.c.l.bf16 %v2133_v0  ;;  %v3201_v29 = vld [vmem:[%s2900_s20 + $0x10] sm:$0xf] }
  0x3c   : > { %2534 = vmatprep.subr.bf16.mxu1 %v2739_v43 }
  0x3d   : > { %v1153_v49 = vrot.slane %v799_v10, 2 }
  0x3e   : > { %2511 = vmatpush3.bf16.msra.mxu0 %v2738_v42  ;;  %v992_v42 = vpack.c.bf16 %v965_v36, %v962_v35 }
  0x3f   : > { %2535 = vmatpush3.bf16.msra.mxu1 %v2739_v43  ;;  %2512 = vmatprep.subr.bf16.mxu0 %v2742_v44  ;;  %v2760_v43 = vld [vmem:[%s3457_s1 + $0x118] sm:$0xff]   ;;  %v1154_v53 = vsel %vm594_vm1, %v1152_v27, %v1153_v49 }
  0x40   : > { %2536 = vmatprep.subr.bf16.mxu1 %v2743_v45 }
  0x42   : > { %2513 = vmatpush3.bf16.msra.mxu0 %v2742_v44  ;;  %v1166_v44 = vpack.c.bf16 %v1139_v39, %v1136_v38  ;;  %v974_v39 = vsel %vm314_vm0, %v972_v8, %v973_v17  ;;  %v3261_v8 = vld [vmem:[%s2900_s20 + $0x20] sm:$0xf]  ;;  %v2781_v17 = vld [vmem:[%s3457_s1 + $0x1c8] sm:$0xff]  }
  0x43   : > { %2537 = vmatpush3.bf16.msra.mxu1 %v2743_v45  ;;  %2514 = vmatprep.subr.bf16.mxu0 %v2744_v50  ;;  %v2761_v45 = vld [vmem:[%s3457_s1 + $0x158] sm:$0xff]  }
  0x44   : > { %2538 = vmatprep.subr.bf16.mxu1 %v2745_v20 }
  0x46   : > { %2515 = vmatpush3.bf16.msra.mxu0 %v2744_v50  ;;  %v2762_v50 = vld [vmem:[%s3457_s1 + $0x110] sm:$0xff]  }
  0x47   : > { %2539 = vmatpush3.bf16.msra.mxu1 %v2745_v20  ;;  %2516 = vmatprep.subr.bf16.mxu0 %v2746_v21  ;;  %v791_v20 = vunpack.c.l.bf16 %v2125_v46 }
  0x48   : > { %2540 = vmatprep.subr.bf16.mxu1 %v2747_v24 }
  0x49   : > { %v967_v57 = vrot.slane %v791_v20, 1 }
  0x4a   : > { %2517 = vmatpush3.bf16.msra.mxu0 %v2746_v21  ;;  %v793_v21 = vunpack.c.l.bf16 %v2127_v47 }
  0x4b   : > { %2541 = vmatpush3.bf16.msra.mxu1 %v2747_v24  ;;  %2550 = vmatprep.subr.bf16.mxu0 %v2749_v52  ;;  %v966_v24 = vrot.slane %v790_v48, 1  ;;  %v2770_v48 = vld [vmem:[%s3457_s1 + $0x1b0] sm:$0xff]  }
  0x4c   : > { %2574 = vmatprep.subr.bf16.mxu1 %v2750_v60  ;;  %v970_v56 = vrot.slane %v793_v21, 1  ;;  %v1144_v61 = vrot.slane %v793_v21, 2 }
  0x4d   : > { %2519 = vmatmul.mubr.bf16.vlgmr.msra.gmra.mxu0 %v628_v54  ;;  %v800_v54 = vunpack.c.l.bf16 %v3137_v31  ;;  %v968_v63 = vsel %vm314_vm0, %v966_v24, %v967_v57  ;;  %v3204_v31 = vld [vmem:[%s2900_s20 + $0x18] sm:$0xf] }
  0x4e   : > { %2543 = vmatmul.mubr.bf16.vlgmr.msra.gmra.mxu1 %v2137_v13  ;;  %2551 = vmatpush3.bf16.msra.mxu0 %v2749_v52  ;;  %v2131_v52 = vld [vmem:[%s2900_s20 + $0x34] sm:$0x1]  ;;  %v1149_v13 = vrot.slane %v796_v51, 2  ;;  %v971_v4 = vsel %vm314_vm0, %v969_v25, %v970_v56  ;;  %v2228_v0 = vcombine.low %v3201_v29, %v3204_v31 }
  0x4f   : > { %2575 = vmatpush3.bf16.msra.mxu1 %v2750_v60  ;;  %2552 = vmatprep.subr.bf16.mxu0 %v2752_v2  ;;  %v1141_v60 = vrot.slane %v791_v20, 2  ;;  %v797_v6 = vunpack.c.l.bf16 %v2131_v52  ;;  %v981_v15 = vrot.slane %v800_v54, 1  ;;  %v993_v35 = vpack.c.bf16 %v971_v4, %v968_v63  ;;  %v2771_v20 = vld [vmem:[%s3457_s1 + $0x1f0] sm:$0xff]   ;;  %v2772_v52 = vld [vmem:[%s3457_s1 + $0x1a8] sm:$0xff]  }
  0x50   : > { %2576 = vmatprep.subr.bf16.mxu1 %v2753_v3  ;;  %2522 = vmatprep.mubr.bf16.mxu0 %v629_v5  ;;  %v1145_v5 = vsel %vm594_vm1, %v1143_v58, %v1144_v61  ;;  %v1155_v47 = vrot.slane %v800_v54, 2  ;;  %v2775_v61 = vld [vmem:[%s3457_s1 + $0x1e0] sm:$0xff]  }
  0x51   : > { %2546 = vmatprep.mubr.bf16.mxu1 %v2138_v12  ;;  %v801_v12 = vunpack.c.l.bf16 %v2135_v7  ;;  %v976_v18 = vrot.slane %v797_v6, 1  ;;  %v2777_v7 = vld [vmem:[%s3457_s1 + $0x1d8] sm:$0xff]  }
  0x52   : > { %2553 = vmatpush3.bf16.msra.mxu0 %v2752_v2  ;;  %v2767_v2 = vld [vmem:[%s3457_s1 + $0x140] sm:$0xff]  }
  0x53   : > { %2577 = vmatpush3.bf16.msra.mxu1 %v2753_v3  ;;  %2554 = vmatprep.subr.bf16.mxu0 %v2754_v22  ;;  %v1142_v3 = vsel %vm594_vm1, %v1140_v26, %v1141_v60  ;;  %v982_v38 = vrot.slane %v801_v12, 1  ;;  %v2774_v60 = vld [vmem:[%s3457_s1 + $0x1a0] sm:$0xff]  }
  0x54   : > { %2578 = vmatprep.subr.bf16.mxu1 %v2755_v32  ;;  %v1167_v36 = vpack.c.bf16 %v1145_v5, %v1142_v3  ;;  %v2780_v3 = vld [vmem:[%s3457_s1 + $0x188] sm:$0xff]   ;;  %v3286_v5 = vld [vmem:[%s2900_s20 + $0x30] sm:$0xf] }
  0x55   : > { %2523 = vmatmul.mubr.bf16.gmra.mxu0 %v630_v34  ;;  %v3210_v34 = vld [vmem:[%s2900_s20 + $0x1c] sm:$0x1]  ;;  %v983_v24 = vsel %vm314_vm0, %v981_v15, %v982_v38  ;;  %v2779_v15 = vld [vmem:[%s3457_s1 + $0x1d0] sm:$0xff]   ;;  %v2782_v38 = vld [vmem:[%s3457_s1 + $0x180] sm:$0xff]  }
  0x56   : > { %2555 = vmatpush3.bf16.msra.mxu0 %v2754_v22  ;;  %2547 = vmatmul.mubr.bf16.gmra.mxu1 %v2139_v37  ;;  %v1150_v22 = vrot.slane %v797_v6, 2  ;;  %v979_v37 = vrot.slane %v799_v10, 1  ;;  %v1328_v46 = vunpack.c.l.bf16 %v3210_v34  ;;  %v2776_v6 = vld [vmem:[%s3457_s1 + $0x198] sm:$0xff]  }
  0x57   : > { %2579 = vmatpush3.bf16.msra.mxu1 %v2755_v32  ;;  %2556 = vmatprep.subr.bf16.mxu0 %v2758_v40  ;;  %v3207_v32 = vld [vmem:[%s2900_s20 + $0x14] sm:$0x1]  ;;  %v3289_v10 = vld [vmem:[%s2900_s20 + $0x38] sm:$0xf] }
  0x58   : > { %2580 = vmatprep.subr.bf16.mxu1 %v2759_v41  ;;  %2566 = vmatprep.mubr.bf16.mxu0 %v992_v42  ;;  %v1151_v42 = vsel %vm594_vm1, %v1149_v13, %v1150_v22  ;;  %v1503_v51 = vrot.slane %v1328_v46, 1  ;;  %v3270_v13 = vld [vmem:[%s2900_s20 + $0x2c] sm:$0x1] }
  0x59   : > { %2590 = vmatprep.mubr.bf16.mxu1 %v1166_v44  ;;  %v1327_v44 = vunpack.c.l.bf16 %v3204_v31  ;;  %v2790_v31 = vld [vmem:[%s3457_s1 + $0x228] sm:$0xff]  }
  0x5a   : > { %2557 = vmatpush3.bf16.msra.mxu0 %v2758_v40  ;;  %v977_v40 = vsel %vm314_vm0, %v975_v9, %v976_v18  ;;  %v3264_v9 = vld [vmem:[%s2900_s20 + $0x28] sm:$0xf] }
  0x5b   : > { %2581 = vmatpush3.bf16.msra.mxu1 %v2759_v41  ;;  %2558 = vmatprep.subr.bf16.mxu0 %v2760_v43  ;;  %v1148_v41 = vsel %vm594_vm1, %v1146_v11, %v1147_v19  ;;  %v994_v21 = vpack.c.bf16 %v977_v40, %v974_v39  ;;  %v1502_v30 = vrot.slane %v1327_v44, 1  ;;  %v3267_v11 = vld [vmem:[%s2900_s20 + $0x24] sm:$0x1]  ;;  %v1331_v63 = vunpack.c.l.bf16 %v3264_v9  ;;  %v3313_v40 = vld [vmem:[%s2900_s20 + $0x40] sm:$0xf] }
  0x5c   : > { %2582 = vmatprep.subr.bf16.mxu1 %v2761_v45  ;;  %v1168_v25 = vpack.c.bf16 %v1151_v42, %v1148_v41  ;;  %v1330_v4 = vunpack.c.l.bf16 %v3267_v11  ;;  %v2783_v39 = vld [vmem:[%s3457_s1 + $0x1c0] sm:$0xff]   ;;  %v3316_v41 = vld [vmem:[%s2900_s20 + $0x48] sm:$0xf] }
  0x5d   : > { %v1508_v19 = vrot.slane %v1331_v63, 1  ;;  %v3319_v42 = vld [vmem:[%s2900_s20 + $0x44] sm:$0x1]  ;;  %v2231_v34 = vcombine.low %v3313_v40, %v3316_v41 }
  0x5e   : > { %2559 = vmatpush3.bf16.msra.mxu0 %v2760_v43  ;;  %v1325_v43 = vunpack.c.l.bf16 %v3201_v29  ;;  %v1506_v22 = vrot.slane %v1330_v4, 1  ;;  %v2795_v11 = vld [vmem:[%s3457_s1 + $0x200] sm:$0xff]  }
  0x5f   : > { %2583 = vmatpush3.bf16.msra.mxu1 %v2761_v45  ;;  %2560 = vmatprep.subr.bf16.mxu0 %v2762_v50  ;;  %v1326_v45 = vunpack.c.l.bf16 %v3207_v32 }
  0x60   : > { %2584 = vmatprep.subr.bf16.mxu1 %v2763_v23  ;;  %v1499_v26 = vrot.slane %v1325_v43, 1 }
  0x61   : > { %v1500_v33 = vrot.slane %v1326_v45, 1 }
  0x62   : > { %2561 = vmatpush3.bf16.msra.mxu0 %v2762_v50  ;;  %v1156_v50 = vrot.slane %v801_v12, 2  ;;  %v2221_v12 = vld [vmem:[%s2900_s20 + $0x34] sm:$0x1] }
  0x63   : > { %2585 = vmatpush3.bf16.msra.mxu1 %v2763_v23  ;;  %2562 = vmatprep.subr.bf16.mxu0 %v2764_v55  ;;  %v980_v23 = vsel %vm314_vm0, %v978_v14, %v979_v37  ;;  %v1501_v58 = vsel %vm314_vm0, %v1499_v26, %v1500_v33  ;;  %v2778_v14 = vld [vmem:[%s3457_s1 + $0x190] sm:$0xff]   ;;  %v1339_v26 = vunpack.c.l.bf16 %v3316_v41 }
  0x64   : > { %2586 = vmatprep.subr.bf16.mxu1 %v2765_v59  ;;  %v1157_v54 = vsel %vm594_vm1, %v1155_v47, %v1156_v50  ;;  %v995_v57 = vpack.c.bf16 %v983_v24, %v980_v23  ;;  %v3322_v47 = vld [vmem:[%s2900_s20 + $0x4c] sm:$0x1]  ;;  %v2786_v24 = vld [vmem:[%s3457_s1 + $0x238] sm:$0xff]  }
  0x65   : > { %v1169_v56 = vpack.c.bf16 %v1157_v54, %v1154_v53  ;;  %v1340_v33 = vunpack.c.l.bf16 %v3322_v47 }
  0x66   : > { %2563 = vmatpush3.bf16.msra.mxu0 %v2764_v55  ;;  %v2773_v55 = vld [vmem:[%s3457_s1 + $0x1e8] sm:$0xff]  }
  0x67   : > { %2587 = vmatpush3.bf16.msra.mxu1 %v2765_v59  ;;  %2564 = vmatprep.subr.bf16.mxu0 %v2766_v62  ;;  %v1504_v59 = vsel %vm314_vm0, %v1502_v30, %v1503_v51  ;;  %v1338_v30 = vunpack.c.l.bf16 %v3319_v42  ;;  %v2229_v51 = vcombine.low %v3261_v8, %v3264_v9  ;;  %v1695_v9 = vrot.slane %v1340_v33, 2 }
  0x68   : > { %2588 = vmatprep.subr.bf16.mxu1 %v2767_v2  ;;  %v1531_v1 = vpack.c.bf16 %v1504_v59, %v1501_v58  ;;  %v1521_v59 = vrot.slane %v1340_v33, 1 }
  0x69   : > { %v1518_v58 = vrot.slane %v1338_v30, 1 }
  0x6a   : > { %2565 = vmatpush3.bf16.msra.mxu0 %v2766_v62  ;;  %v1329_v62 = vunpack.c.l.bf16 %v3261_v8  ;;  %v1692_v8 = vrot.slane %v1338_v30, 2 }
  0x6b   : > { %2589 = vmatpush3.bf16.msra.mxu1 %v2767_v2  ;;  %2598 = vmatprep.subr.bf16.mxu0 %v2768_v16  ;;  %v1332_v2 = vunpack.c.l.bf16 %v3270_v13 }
  0x6c   : > { %2622 = vmatprep.subr.bf16.mxu1 %v2769_v28  ;;  %v1505_v18 = vrot.slane %v1329_v62, 1 }
  0x6d   : > { %2567 = vmatmul.mubr.bf16.vlgmr.msra.gmra.mxu0 %v993_v35  ;;  %v1509_v27 = vrot.slane %v1332_v2, 1  ;;  %v1335_v35 = vunpack.c.l.bf16 %v3289_v10 }
  0x6e   : > { %2591 = vmatmul.mubr.bf16.vlgmr.msra.gmra.mxu1 %v1167_v36  ;;  %2599 = vmatpush3.bf16.msra.mxu0 %v2768_v16  ;;  %v2223_v16 = vld [vmem:[%s2900_s20 + $0x3c] sm:$0x1]  ;;  %v1334_v36 = vunpack.c.l.bf16 %v2221_v12  ;;  %v2791_v12 = vld [vmem:[%s3457_s1 + $0x220] sm:$0xff]  }
  0x6f   : > { %2623 = vmatpush3.bf16.msra.mxu1 %v2769_v28  ;;  %2600 = vmatprep.subr.bf16.mxu0 %v2770_v48  ;;  %v1333_v28 = vunpack.c.l.bf16 %v3286_v5  ;;  %v1336_v37 = vunpack.c.l.bf16 %v2223_v16  ;;  %v1510_v49 = vsel %vm314_vm0, %v1508_v19, %v1509_v27  ;;  %v1688_v29 = vrot.slane %v1335_v35, 2  ;;  %v2793_v19 = vld [vmem:[%s3457_s1 + $0x210] sm:$0xff]  }
  0x70   : > { %2624 = vmatprep.subr.bf16.mxu1 %v2771_v20  ;;  %2570 = vmatprep.mubr.bf16.mxu0 %v994_v21  ;;  %v1512_v21 = vrot.slane %v1334_v36, 1  ;;  %v1679_v27 = vrot.slane %v1329_v62, 2 }
  0x71   : > { %2594 = vmatprep.mubr.bf16.mxu1 %v1168_v25  ;;  %v1511_v50 = vrot.slane %v1333_v28, 1  ;;  %v1515_v23 = vrot.slane %v1336_v37, 1  ;;  %v1337_v25 = vunpack.c.l.bf16 %v3313_v40 }
  0x72   : > { %2601 = vmatpush3.bf16.msra.mxu0 %v2770_v48  ;;  %v1507_v48 = vsel %vm314_vm0, %v1505_v18, %v1506_v22  ;;  %v2792_v18 = vld [vmem:[%s3457_s1 + $0x218] sm:$0xff]   ;;  %v2794_v22 = vld [vmem:[%s3457_s1 + $0x208] sm:$0xff]  }
  0x73   : > { %2625 = vmatpush3.bf16.msra.mxu1 %v2771_v20  ;;  %2602 = vmatprep.subr.bf16.mxu0 %v2772_v52  ;;  %v1514_v20 = vrot.slane %v1335_v35, 1  ;;  %v1513_v53 = vsel %vm314_vm0, %v1511_v50, %v1512_v21  ;;  %v1680_v35 = vrot.slane %v1330_v4, 2 }
  0x74   : > { %2626 = vmatprep.subr.bf16.mxu1 %v2773_v55 }
  0x75   : > { %2571 = vmatmul.mubr.bf16.gmra.mxu0 %v995_v57  ;;  %v1516_v54 = vsel %vm314_vm0, %v1514_v20, %v1515_v23  ;;  %v1517_v57 = vrot.slane %v1337_v25, 1  ;;  %v1681_v13 = vsel %vm594_vm1, %v1679_v27, %v1680_v35 }
  0x76   : > { %2603 = vmatpush3.bf16.msra.mxu0 %v2772_v52  ;;  %2595 = vmatmul.mubr.bf16.gmra.mxu1 %v1169_v56  ;;  %v1532_v52 = vpack.c.bf16 %v1510_v49, %v1507_v48  ;;  %v1520_v56 = vrot.slane %v1339_v26, 1  ;;  %v2820_v49 = vmov 0.0  }
  0x77   : > { %2627 = vmatpush3.bf16.msra.mxu1 %v2773_v55  ;;  %2604 = vmatprep.subr.bf16.mxu0 %v2774_v60  ;;  %v2787_v55 = vld [vmem:[%s3457_s1 + $0x230] sm:$0xff]   ;;  %244 = vst [vmem:[%s3412_s19] sm:$0x1] %v2820_v49  ;;  %245 = vst [vmem:[%s3418_s23] sm:$0x1] %v2820_v49 }
  0x78   : > { %2628 = vmatprep.subr.bf16.mxu1 %v2775_v61  ;;  %2614 = vmatprep.mubr.bf16.mxu0 %v2228_v0  ;;  %v1676_v0 = vrot.slane %v1327_v44, 2  ;;  %v1519_v44 = vsel %vm314_vm0, %v1517_v57, %v1518_v58  ;;  %v1522_v32 = vsel %vm314_vm0, %v1520_v56, %v1521_v59 }
  0x79   : > { %2638 = vmatprep.mubr.bf16.mxu1 %v1531_v1  ;;  %v1533_v1 = vpack.c.bf16 %v1516_v54, %v1513_v53 }
  0x7a   : > { %2605 = vmatpush3.bf16.msra.mxu0 %v2774_v60  ;;  %v1673_v60 = vrot.slane %v1325_v43, 2  ;;  %v1686_v43 = vrot.slane %v1334_v36, 2  ;;  %v1683_v36 = vrot.slane %v1332_v2, 2 }
  0x7b   : > { %2629 = vmatpush3.bf16.msra.mxu1 %v2775_v61  ;;  %2606 = vmatprep.subr.bf16.mxu0 %v2776_v6  ;;  %v2230_v61 = vcombine.low %v3286_v5, %v3289_v10 }
  0x7c   : > { %2630 = vmatprep.subr.bf16.mxu1 %v2777_v7 }
  0x7e   : > { %2607 = vmatpush3.bf16.msra.mxu0 %v2776_v6  ;;  %v1674_v6 = vrot.slane %v1326_v45, 2 }
  0x7f   : > { %2631 = vmatpush3.bf16.msra.mxu1 %v2777_v7  ;;  %2608 = vmatprep.subr.bf16.mxu0 %v2778_v14  ;;  %v1677_v7 = vrot.slane %v1328_v46, 2 }
  0x80   : > { %2632 = vmatprep.subr.bf16.mxu1 %v2779_v15  ;;  %v1675_v45 = vsel %vm594_vm1, %v1673_v60, %v1674_v6 }
  0x81   : > { %v1678_v46 = vsel %vm594_vm1, %v1676_v0, %v1677_v7 }
  0x82   : > { %2609 = vmatpush3.bf16.msra.mxu0 %v2778_v14  ;;  %v1685_v14 = vrot.slane %v1333_v28, 2  ;;  %v1705_v16 = vpack.c.bf16 %v1678_v46, %v1675_v45  ;;  %v1682_v28 = vrot.slane %v1331_v63, 2 }
  0x83   : > { %2633 = vmatpush3.bf16.msra.mxu1 %v2779_v15  ;;  %2610 = vmatprep.subr.bf16.mxu0 %v2780_v3  ;;  %v1689_v15 = vrot.slane %v1336_v37, 2  ;;  %v1691_v37 = vrot.slane %v1337_v25, 2 }
  0x84   : > { %2634 = vmatprep.subr.bf16.mxu1 %v2781_v17  ;;  %v1687_v5 = vsel %vm594_vm1, %v1685_v14, %v1686_v43  ;;  %v1684_v62 = vsel %vm594_vm1, %v1682_v28, %v1683_v36 }
  0x85   : > { %v1690_v10 = vsel %vm594_vm1, %v1688_v29, %v1689_v15  ;;  %v1693_v63 = vsel %vm594_vm1, %v1691_v37, %v1692_v8  ;;  %v1706_v2 = vpack.c.bf16 %v1684_v62, %v1681_v13 }
  0x86   : > { %2611 = vmatpush3.bf16.msra.mxu0 %v2780_v3  ;;  %v1534_v3 = vpack.c.bf16 %v1522_v32, %v1519_v44 }
  0x87   : > { %2635 = vmatpush3.bf16.msra.mxu1 %v2781_v17  ;;  %2612 = vmatprep.subr.bf16.mxu0 %v2782_v38  ;;  %v1707_v17 = vpack.c.bf16 %v1690_v10, %v1687_v5 }
  0x88   : > { %2636 = vmatprep.subr.bf16.mxu1 %v2783_v39 }
  0x8a   : > { %2613 = vmatpush3.bf16.msra.mxu0 %v2782_v38  ;;  %v1694_v38 = vrot.slane %v1339_v26, 2 }
  0x8b   : > { %2637 = vmatpush3.bf16.msra.mxu1 %v2783_v39  ;;  %2646 = vmatprep.subr.bf16.mxu0 %v2786_v24 }
  0x8c   : > { %2670 = vmatprep.subr.bf16.mxu1 %v2786_v24  ;;  %v1696_v4 = vsel %vm594_vm1, %v1694_v38, %v1695_v9 }
  0x8d   : > { %2615 = vmatmul.mubr.bf16.vlgmr.msra.gmra.mxu0 %v2229_v51  ;;  %v1708_v39 = vpack.c.bf16 %v1696_v4, %v1693_v63 }
  0x8e   : > { %2639 = vmatmul.mubr.bf16.vlgmr.msra.gmra.mxu1 %v1532_v52  ;;  %2647 = vmatpush3.bf16.msra.mxu0 %v2786_v24 }
  0x8f   : > { %2678 = vmatpush3.bf16.msra.mxu1 %v2786_v24  ;;  %2648 = vmatprep.subr.bf16.mxu0 %v2787_v55 }
  0x90   : > { %2671 = vmatprep.subr.bf16.mxu1 %v2787_v55  ;;  %2618 = vmatprep.mubr.bf16.mxu0 %v2230_v61 }
  0x91   : > { %2642 = vmatprep.mubr.bf16.mxu1 %v1533_v1 }
  0x92   : > { %2649 = vmatpush3.bf16.msra.mxu0 %v2787_v55 }
  0x93   : > { %2679 = vmatpush3.bf16.msra.mxu1 %v2787_v55  ;;  %2650 = vmatprep.subr.bf16.mxu0 %v2790_v31 }
  0x94   : > { %2672 = vmatprep.subr.bf16.mxu1 %v2790_v31 }
  0x95   : > { %2619 = vmatmul.mubr.bf16.gmra.mxu0 %v2231_v34 }
  0x96   : > { %2651 = vmatpush3.bf16.msra.mxu0 %v2790_v31  ;;  %2643 = vmatmul.mubr.bf16.gmra.mxu1 %v1534_v3 }
  0x97   : > { %2680 = vmatpush3.bf16.msra.mxu1 %v2790_v31  ;;  %2652 = vmatprep.subr.bf16.mxu0 %v2791_v12 }
  0x98   : > { %2673 = vmatprep.subr.bf16.mxu1 %v2791_v12  ;;  %2662 = vmatprep.mubr.bf16.mxu0 %v1705_v16 }
  0x99   : > { %2666 = vmatprep.mubr.bf16.mxu1 %v1707_v17 }
  0x9a   : > { %2653 = vmatpush3.bf16.msra.mxu0 %v2791_v12 }
  0x9b   : > { %2681 = vmatpush3.bf16.msra.mxu1 %v2791_v12  ;;  %2654 = vmatprep.subr.bf16.mxu0 %v2792_v18 }
  0x9c   : > { %2674 = vmatprep.subr.bf16.mxu1 %v2792_v18 }
  0x9e   : > { %2655 = vmatpush3.bf16.msra.mxu0 %v2792_v18 }
  0x9f   : > { %2682 = vmatpush3.bf16.msra.mxu1 %v2792_v18  ;;  %2656 = vmatprep.subr.bf16.mxu0 %v2793_v19 }
  0xa0   : > { %2675 = vmatprep.subr.bf16.mxu1 %v2793_v19 }
  0xa2   : > { %2657 = vmatpush3.bf16.msra.mxu0 %v2793_v19 }
  0xa3   : > { %2683 = vmatpush3.bf16.msra.mxu1 %v2793_v19  ;;  %2658 = vmatprep.subr.bf16.mxu0 %v2794_v22 }
  0xa4   : > { %2676 = vmatprep.subr.bf16.mxu1 %v2794_v22 }
  0xa6   : > { %2659 = vmatpush3.bf16.msra.mxu0 %v2794_v22 }
  0xa7   : > { %2684 = vmatpush3.bf16.msra.mxu1 %v2794_v22  ;;  %2660 = vmatprep.subr.bf16.mxu0 %v2795_v11 }
  0xa8   : > { %2677 = vmatprep.subr.bf16.mxu1 %v2795_v11 }
  0xaa   : > { %2661 = vmatpush3.bf16.msra.mxu0 %v2795_v11 }
  0xab   : > { %2685 = vmatpush3.bf16.msra.mxu1 %v2795_v11 }
  0xad   : > { %2663 = vmatmul.mubr.bf16.vlgmr.msra.gmra.mxu0 %v1706_v2 }
  0xae   : > { %2667 = vmatmul.mubr.bf16.vlgmr.msra.gmra.mxu1 %v1708_v39 }
  0xed   : > { %v2472_v40 = vpop.f32.mrf.mxu0 }
  0xee   : > { %v2496_v41 = vpop.f32.mrf.mxu1 }
  0xef   : > { %v3404_v42 = vpop.f32.mrf.mxu0  ;;  %v572_v11 = vadd.f32 %v2496_v41, %v2472_v40 }
  0xf0   : > { %v3406_v47 = vpop.f32.mrf.mxu1 }
  0xf1   : > { %v2473_v48 = vpop.f32.mrf.mxu0  ;;  %v564_v2 = vadd.f32 %v3406_v47, %v3404_v42 }
  0xf2   : > { %v2497_v50 = vpop.f32.mrf.mxu1 }
  0xf3   : > { %v453_v20 = vpop.f32.mrf.mxu0  ;;  %v575_v13 = vadd.f32 %v2497_v50, %v2473_v48 }
  0xf4   : > { %v566_v21 = vpop.f32.mrf.mxu1 }
  0xf5   : > { %v2476_v23 = vpop.f32.mrf.mxu0  ;;  %v567_v39 = vadd.f32 %v566_v21, %v453_v20 }
  0xf6   : > { %v2500_v24 = vpop.f32.mrf.mxu1 }
  0xf7   : > { %v466_v25 = vpop.f32.mrf.mxu0  ;;  %v588_v62 = vadd.f32 %v2500_v24, %v2476_v23 }
  0xf8   : > { %v579_v26 = vpop.f32.mrf.mxu1 }
  0xf9   : > { %v2477_v30 = vpop.f32.mrf.mxu0 }
  0xfa   : > { %v2501_v33 = vpop.f32.mrf.mxu1 }
  0xfb   : > { %v469_v51 = vpop.f32.mrf.mxu0  ;;  %v591_v63 = vadd.f32 %v2501_v33, %v2477_v30 }
  0xfc   : > { %v582_v52 = vpop.f32.mrf.mxu1 }
 0x10d   : > { %v2520_v53 = vpop.f32.mrf.mxu0 }
 0x10e   : > { %v2544_v54 = vpop.f32.mrf.mxu1  ;;  %v763_v49 = vadd.f32 %v2520_v53, %v572_v11 }
 0x10f   : > { %v730_v55 = vpop.f32.mrf.mxu0 }
 0x110   : > { %v905_v57 = vpop.f32.mrf.mxu1  ;;  %v761_v41 = vadd.f32 %v730_v55, %v564_v2  ;;  %v938_v30 = vadd.f32 %v2544_v54, %v763_v49 }
 0x111   : > { %v2521_v56 = vpop.f32.mrf.mxu0 }
 0x112   : > { %v2545_v58 = vpop.f32.mrf.mxu1  ;;  %v936_v21 = vadd.f32 %v905_v57, %v761_v41 }
 0x113   : > { %v733_v59 = vpop.f32.mrf.mxu0 }
 0x114   : > { %v908_v60 = vpop.f32.mrf.mxu1  ;;  %v762_v48 = vadd.f32 %v733_v59, %v567_v39 }
 0x115   : > { %v2524_v61 = vpop.f32.mrf.mxu0 }
 0x116   : > { %v2548_v0 = vpop.f32.mrf.mxu1  ;;  %v937_v11 = vadd.f32 %v908_v60, %v762_v48 }
 0x117   : > { %v746_v1 = vpop.f32.mrf.mxu0 }
 0x118   : > { %v921_v6 = vpop.f32.mrf.mxu1 }
 0x119   : > { %v2525_v7 = vpop.f32.mrf.mxu0 }
 0x11a   : > { %v2549_v14 = vpop.f32.mrf.mxu1  ;;  %v768_v40 = vadd.f32 %v2525_v7, %v591_v63 }
 0x11b   : > { %v749_v29 = vpop.f32.mrf.mxu0 }
 0x11c   : > { %v924_v43 = vpop.f32.mrf.mxu1  ;;  %v943_v20 = vadd.f32 %v2549_v14, %v768_v40 }
 0x12d   : > { %v2568_v15 = vpop.f32.mrf.mxu0 }
 0x12e   : > { %v2592_v31 = vpop.f32.mrf.mxu1  ;;  %v1128_v53 = vadd.f32 %v2568_v15, %v938_v30 }
 0x12f   : > { %v1095_v44 = vpop.f32.mrf.mxu0 }
 0x130   : > { %v3422_v32 = vpop.f32.mrf.mxu1 }
 0x131   : > { %3461 = vst [vmem:[#allocation2_spill] sm:$0xff] %v3422_v32  ;;  %v2569_v34 = vpop.f32.mrf.mxu0 }
 0x132   : > { %v2593_v45 = vpop.f32.mrf.mxu1 }
 0x133   : > { %v1098_v46 = vpop.f32.mrf.mxu0 }
 0x134   : > { %v1272_v3 = vpop.f32.mrf.mxu1  ;;  %v1127_v55 = vadd.f32 %v1098_v46, %v937_v11 }
 0x135   : > { %v2572_v5 = vpop.f32.mrf.mxu0 }
 0x136   : > { %v2596_v10 = vpop.f32.mrf.mxu1  ;;  %v1301_v60 = vadd.f32 %v1272_v3, %v1127_v55 }
 0x137   : > { %v1111_v12 = vpop.f32.mrf.mxu0 }
 0x138   : > { %v1285_v16 = vpop.f32.mrf.mxu1  ;;  %v3466_v14 = vld [vmem:[#allocation2_spill] sm:$0xff] }
 0x139   : > { %v2573_v17 = vpop.f32.mrf.mxu0 }
 0x13a   : > { %v2597_v18 = vpop.f32.mrf.mxu1 }
 0x13b   : > { %v1114_v19 = vpop.f32.mrf.mxu0 }
 0x13c   : > { %v1288_v22 = vpop.f32.mrf.mxu1 }
 0x14d   : > { %v2616_v27 = vpop.f32.mrf.mxu0 }
 0x14e   : > { %v3424_v28 = vpop.f32.mrf.mxu1 }
 0x14f   : > { %3462 = vst [vmem:[#allocation3_spill] sm:$0xff] %v3424_v28  ;;  %v1444_v35 = vpop.f32.mrf.mxu0  ;;  %v764_v28 = vadd.f32 %v2521_v56, %v575_v13 }
 0x150   : > { %v3426_v36 = vpop.f32.mrf.mxu1 }
 0x151   : > { %3463 = vst [vmem:[#allocation4_spill] sm:$0xff] %v3426_v36  ;;  %v2617_v37 = vpop.f32.mrf.mxu0  ;;  %v580_v36 = vadd.f32 %v579_v26, %v466_v25  ;;  %v939_v33 = vadd.f32 %v2545_v58, %v764_v28 }
 0x152   : > { %v3428_v38 = vpop.f32.mrf.mxu1 }
 0x153   : > { %3464 = vst [vmem:[#allocation5_spill] sm:$0xff] %v3428_v38  ;;  %v1447_v8 = vpop.f32.mrf.mxu0  ;;  %v583_v38 = vadd.f32 %v582_v52, %v469_v51  ;;  %v765_v50 = vadd.f32 %v746_v1, %v580_v36  ;;  %v1129_v13 = vadd.f32 %v2569_v34, %v939_v33  ;;  %v1133_v51 = vadd.f32 %v2573_v17, %v943_v20 }
 0x154   : > { %v3430_v9 = vpop.f32.mrf.mxu1 }
 0x155   : > { %3465 = vst [vmem:[#allocation6_spill] sm:$0xff] %v3430_v9  ;;  %v2620_v4 = vpop.f32.mrf.mxu0  ;;  %v767_v9 = vadd.f32 %v2524_v61, %v588_v62  ;;  %v766_v23 = vadd.f32 %v749_v29, %v583_v38  ;;  %v940_v56 = vadd.f32 %v921_v6, %v765_v50  ;;  %v1126_v61 = vadd.f32 %v1095_v44, %v936_v21 }
 0x156   : > { %v2644_v32 = vpop.f32.mrf.mxu1  ;;  %v1302_v29 = vadd.f32 %v2592_v31, %v1128_v53  ;;  %v1303_v54 = vadd.f32 %v2593_v45, %v1129_v13  ;;  %v1307_v28 = vadd.f32 %v2597_v18, %v1133_v51  ;;  %v3467_v18 = vld [vmem:[#allocation3_spill] sm:$0xff] }
 0x157   : > { %v1460_v24 = vpop.f32.mrf.mxu0  ;;  %v942_v47 = vadd.f32 %v2548_v0, %v767_v9  ;;  %v941_v25 = vadd.f32 %v924_v43, %v766_v23  ;;  %v1130_v1 = vadd.f32 %v1111_v12, %v940_v56  ;;  %v1300_v57 = vadd.f32 %v3466_v14, %v1126_v61 }
 0x158   : > { %v1650_v42 = vpop.f32.mrf.mxu1  ;;  %v1477_v15 = vadd.f32 %v2616_v27, %v1302_v29  ;;  %v1478_v34 = vadd.f32 %v2617_v37, %v1303_v54  ;;  %v1476_v12 = vadd.f32 %v1447_v8, %v1301_v60 }
 0x159   : > { %v1132_v26 = vadd.f32 %v2572_v5, %v942_v47  ;;  %v2621_v52 = vpop.f32.mrf.mxu0  ;;  %v1131_v7 = vadd.f32 %v1114_v19, %v941_v25  ;;  %v1304_v43 = vadd.f32 %v1285_v16, %v1130_v1  ;;  %v1475_v36 = vadd.f32 %v1444_v35, %v1300_v57  ;;  %v3469_v16 = vld [vmem:[#allocation4_spill] sm:$0xff] }
 0x15a   : > { %v2645_v59 = vpop.f32.mrf.mxu1  ;;  %v1482_v44 = vadd.f32 %v2621_v52, %v1307_v28  ;;  %v1667_v38 = vadd.f32 %v3467_v18, %v1477_v15  ;;  %v3468_v9 = vld [vmem:[#allocation5_spill] sm:$0xff] }
 0x15b   : > { %v1306_v58 = vadd.f32 %v2596_v10, %v1132_v26  ;;  %v1463_v0 = vpop.f32.mrf.mxu0  ;;  %v1305_v5 = vadd.f32 %v1288_v22, %v1131_v7  ;;  %v1479_v31 = vadd.f32 %v1460_v24, %v1304_v43  ;;  %v1668_v62 = vadd.f32 %v3468_v9, %v1478_v34 }
 0x15c   : > { %v1653_v6 = vpop.f32.mrf.mxu1  ;;  %v1672_v37 = vadd.f32 %v2645_v59, %v1482_v44  ;;  %v1665_v22 = vadd.f32 %v3469_v16, %v1475_v36 }
 0x15d   : > { %v1481_v17 = vadd.f32 %v2620_v4, %v1306_v58  ;;  %v1480_v45 = vadd.f32 %v1463_v0, %v1305_v5  ;;  %v3470_v4 = vld [vmem:[#allocation6_spill] sm:$0xff]  ;;  %v1669_v49 = vadd.f32 %v1650_v42, %v1479_v31 }
 0x15e   : > { %v1666_v2 = vadd.f32 %v3470_v4, %v1476_v12 }
 0x15f   : > { %v1671_v27 = vadd.f32 %v2644_v32, %v1481_v17  ;;  %v1670_v40 = vadd.f32 %v1653_v6, %v1480_v45 }
 0x16d   : > { %v2664_v46 = vpop.f32.mrf.mxu0 }
 0x16e   : > { %v2668_v19 = vpop.f32.mrf.mxu1  ;;  %v1841_v39 = vadd.f32 %v2664_v46, %v1667_v38 }
 0x16f   : > { %v1808_v10 = vpop.f32.mrf.mxu0  ;;  %v1845_v41 = vadd.f32 %v2668_v19, %v1671_v27 }
 0x170   : > { %v1824_v3 = vpop.f32.mrf.mxu1  ;;  %v1839_v23 = vadd.f32 %v1808_v10, %v1665_v22 }
 0x171   : > { %v2665_v63 = vpop.f32.mrf.mxu0  ;;  %v1843_v33 = vadd.f32 %v1824_v3, %v1669_v49  ;;  %v1895_v3 = vld [vmem:[%s3412_s19] sm:$0x1] }
 0x172   : > { %v1842_v35 = vadd.f32 %v2665_v63, %v1668_v62  ;;  %v2669_v8 = vpop.f32.mrf.mxu1  ;;  %v1911_v63 = vld [vmem:[%s3418_s23] sm:$0x1] }
 0x173   : > { %v1846_v48 = vadd.f32 %v2669_v8, %v1672_v37  ;;  %v1811_v50 = vpop.f32.mrf.mxu0 }
 0x174   : > { %v1848_v32 = vpack.c.bf16 %v1842_v35, %v1841_v39  ;;  %v1840_v24 = vadd.f32 %v1811_v50, %v1666_v2  ;;  %v1827_v30 = vpop.f32.mrf.mxu1 }
 0x175   : > { %v1850_v47 = vpack.c.bf16 %v1846_v48, %v1845_v41  ;;  %v1844_v20 = vadd.f32 %v1827_v30, %v1670_v40 }
 0x176   : > { %2343 = vst [vmem:[%s231_s26 + $0x8] sm:$0xff] %v1848_v32   ;;  %v1847_v21 = vpack.c.bf16 %v1840_v24, %v1839_v23  ;;  %v1889_v42 = vunpack.c.l.bf16 %v1848_v32  ;;  %v1890_v56 = vunpack.c.h.bf16 %v1848_v32 }
 0x177   : > { %2345 = vst [vmem:[%s231_s26 + $0x18] sm:$0xff] %v1850_v47   ;;  %v1849_v11 = vpack.c.bf16 %v1844_v20, %v1843_v33  ;;  %v1893_v58 = vunpack.c.l.bf16 %v1850_v47  ;;  %v1894_v57 = vunpack.c.h.bf16 %v1850_v47 }
 0x178   : > { %2327 = vst [vmem:[%s231_s26] sm:$0xff] %v1847_v21   ;;  %v1887_v53 = vunpack.c.l.bf16 %v1847_v21  ;;  %v1888_v13 = vunpack.c.h.bf16 %v1847_v21  ;;  %v1914_v52 = vmul.f32 %v1889_v42, %v1889_v42  ;;  %v1915_v1 = vmul.f32 %v1890_v56, %v1890_v56 }
 0x179   : > { %2344 = vst [vmem:[%s231_s26 + $0x10] sm:$0xff] %v1849_v11   ;;  %v1891_v59 = vunpack.c.l.bf16 %v1849_v11  ;;  %v1892_v29 = vunpack.c.h.bf16 %v1849_v11  ;;  %v1918_v6 = vmul.f32 %v1893_v58, %v1893_v58  ;;  %v1919_v17 = vmul.f32 %v1894_v57, %v1894_v57 }
 0x17a   : > { %v1896_v25 = vadd.f32 %v1888_v13, %v1887_v53  ;;  %v1912_v26 = vmul.f32 %v1887_v53, %v1887_v53  ;;  %v1913_v51 = vmul.f32 %v1888_v13, %v1888_v13 }
 0x17b   : > { %v1916_v0 = vmul.f32 %v1891_v59, %v1891_v59  ;;  %v1917_v15 = vmul.f32 %v1892_v29, %v1892_v29 }
 0x17c   : > { %v1897_v61 = vadd.f32 %v1896_v25, %v1889_v42  ;;  %v1920_v55 = vadd.f32 %v1913_v51, %v1912_v26 }
 0x17e   : > { %v1921_v7 = vadd.f32 %v1920_v55, %v1914_v52  ;;  %v1898_v54 = vadd.f32 %v1897_v61, %v1890_v56 }
 0x180   : > { %v1899_v28 = vadd.f32 %v1898_v54, %v1891_v59  ;;  %v1922_v14 = vadd.f32 %v1921_v7, %v1915_v1 }
 0x182   : > { %v1900_v60 = vadd.f32 %v1899_v28, %v1892_v29  ;;  %v1923_v34 = vadd.f32 %v1922_v14, %v1916_v0 }
 0x184   : > { %v1901_v43 = vadd.f32 %v1900_v60, %v1893_v58  ;;  %v1924_v5 = vadd.f32 %v1923_v34, %v1917_v15 }
 0x186   : > { %v1902_v44 = vadd.f32 %v1901_v43, %v1894_v57  ;;  %v1925_v46 = vadd.f32 %v1924_v5, %v1918_v6 }
 0x188   : > { %v1903_v36 = vrot.slane %v1902_v44, 4  ;;  %v1926_v12 = vadd.f32 %v1925_v46, %v1919_v17 }
 0x18a   : > { %v1904_v19 = vadd.f32 %v1903_v36, %v1902_v44  ;;  %v1927_v31 = vrot.slane %v1926_v12, 4 }
 0x18c   : > { %v1905_v45 = vrot.slane %v1904_v19, 2  ;;  %v1928_v10 = vadd.f32 %v1927_v31, %v1926_v12 }
 0x18e   : > { %v1906_v18 = vadd.f32 %v1905_v45, %v1904_v19  ;;  %v1929_v38 = vrot.slane %v1928_v10, 2 }
 0x190   : > { %v1907_v9 = vrot.slane %v1906_v18, 1  ;;  %v1930_v62 = vadd.f32 %v1929_v38, %v1928_v10 }
 0x192   : > { %v1908_v27 = vadd.f32 %v1907_v9, %v1906_v18  ;;  %v1931_v37 = vrot.slane %v1930_v62, 1 }
 0x194   : > { %v1909_v16 = vadd.f32 %v1908_v27, %v1895_v3  ;;  %v1932_v22 = vadd.f32 %v1931_v37, %v1930_v62 }
 0x196   : > { %1910 = vst [vmem:[%s3412_s19] sm:$0x1] %v1909_v16  ;;  %v1933_v4 = vadd.f32 %v1932_v22, %v1911_v63 }
 0x198   : > { %1934 = vst [vmem:[%s3418_s23] sm:$0x1] %v1933_v4 }
 0x199 PF: > { %s15_s17 = sadd.s32 1, %s2818_s17   ;;  %s3471_s15 = smov %s2814_s16 }
 0x19a   : > { %p12_p5 = scmp.ge.s32.totalorder %s15_s17, 4   ;;  %s3472_s16 = smov %s3474_s18 }
 0x19c   :  { %14 = sbr.rel (!%p12_p5) target bundleno = 2 (0x2), region = 96 }

</bundles_post_ra>
